<compile_context>
chip_gen: v7x
topology: tpu7x:2x2x1
jax: 0.10.0
libtpu: 0.0.40
codegen_flags: <defaults>
</compile_context>

<pallas_src>
import functools

import numpy as np
import jax
import jax.numpy as jnp
from jax import lax
from jax.experimental import pallas as pl
from jax.experimental.pallas import tpu as pltpu


# -----------------------------------------------------------------------------
# VMEM-aware sizing helpers
# -----------------------------------------------------------------------------
@functools.lru_cache(maxsize=1)
def _vmem_capacity_bytes():
    try:
        return int(pltpu.get_tpu_info().vmem_capacity_bytes)
    except Exception:
        return 64 << 20                       # v7x-conservative fallback


def _vmem_limit_bytes():
    return int(min((_vmem_capacity_bytes() * 3) // 4, 100 << 20))


def _tile_budget_bytes():
    # Tiles (double-buffered ins/outs) get ~1/3 of VMEM; the rest is headroom for
    # resident weights, scratch and compiler temporaries.
    return int(min(_vmem_capacity_bytes() // 3, 24 << 20))


def _compiler_params(*sem):
    return pltpu.CompilerParams(dimension_semantics=sem,
                                vmem_limit_bytes=_vmem_limit_bytes())


def _itemsize(dt):
    return np.dtype(dt).itemsize


def _pick_row_tile(N, per_row_bytes, fixed_bytes):
    """Largest row tile that divides N, stays (8,128)-legal and fits the budget."""
    avail = max(_tile_budget_bytes() - fixed_bytes, 64 << 10)
    cap_rows = max(8, avail // max(per_row_bytes, 1))
    if N <= cap_rows:
        return N
    hi = int(cap_rows) - int(cap_rows) % 8
    for d in range(hi, 7, -8):
        if N % d == 0:
            return d
    return N                                   # no 8-aligned divisor fits; one block


def _pick_col_tile(V, cap=1024):
    """Lane-dense vocab tile for the FC head (multiple of 128 dividing V)."""
    if V <= cap:
        return V
    hi = cap - cap % 128
    for d in range(hi, 127, -128):
        if V % d == 0:
            return d
    return V


def _pick_t_tile(T, Bb, H, gx_bytes, h_bytes, fixed_bytes=0, requested=None):
    """Time tile for the recurrent kernel: double-buffered gx(3H)+out(H) tiles for
    both directions, plus resident weights/scratch, must fit the VMEM budget."""
    if requested is not None and 0 < requested <= T and T % requested == 0:
        return requested
    avail = max(_tile_budget_bytes() - fixed_bytes, 256 << 10)
    per_step = 2 * 2 * Bb * (3 * H * gx_bytes + H * h_bytes)   # dirs * double-buffer
    cap_steps = max(1, avail // max(per_step, 1))
    best = 1
    for d in range(1, T + 1):
        if T % d == 0 and d <= cap_steps:
            best = d
    return best


def _pick_unroll(t_tile, Bb, H):
    """Unroll the serial recurrence as far as vreg pressure allows."""
    elems = Bb * 3 * H                  # live gate-slab f32 elements per dir per step
    if elems <= 2048:
        max_u = 8
    elif elems <= 8192:
        max_u = 4
    else:
        max_u = 2
    if t_tile <= max_u:
        return t_tile
    for u in (8, 4, 2):
        if u <= max_u and t_tile % u == 0:
            return u
    return 2 if t_tile % 2 == 0 else 1


# -----------------------------------------------------------------------------
# Pallas kernels
# -----------------------------------------------------------------------------
def _gru_cell(gx, h, w_hh, b_hn, H):
    """One GRU step, gate order [r | z | n] (f32 gate math, MXU-dtype matmul).

    b_ih (all gates) and the r/z parts of b_hh are pre-folded into gx; only the
    n-gate hidden bias stays inside the r* product (PyTorch semantics:
    n = tanh(W_in x + b_in + r * (W_hn h + b_hn)))."""
    gh = jnp.dot(h.astype(w_hh.dtype), w_hh, preferred_element_type=jnp.float32)
    r = jax.nn.sigmoid(gx[:, 0:H] + gh[:, 0:H])
    z = jax.nn.sigmoid(gx[:, H:2 * H] + gh[:, H:2 * H])
    n = jnp.tanh(gx[:, 2 * H:3 * H] + r * (gh[:, 2 * H:3 * H] + b_hn))
    return (1.0 - z) * n + z * h


def _make_bigru_kernel(t_tile, unroll):
    """Fused fwd+bwd recurrence over one (batch-block, time-block) grid cell;
    the carried hidden states live in f32 VMEM scratch."""

    def kernel(gxf_ref, gxb_ref, whf_ref, whb_ref, bnf_ref, bnb_ref,
               of_ref, ob_ref, hf_sc, hb_sc):
        @pl.when(pl.program_id(1) == 0)          # first time block of this batch block
        def _():
            hf_sc[...] = jnp.zeros_like(hf_sc)
            hb_sc[...] = jnp.zeros_like(hb_sc)

        whf = whf_ref[...]
        whb = whb_ref[...]
        H = whf.shape[0]
        Bb = hf_sc.shape[0]
        # Hoist the (1,H)->(Bb,H) bias broadcasts out of the serial loop
        # (JAX does not CSE broadcast_in_dim).
        bnf = jnp.broadcast_to(bnf_ref[...], (Bb, H))
        bnb = jnp.broadcast_to(bnb_ref[...], (Bb, H))

        def step(i, carry):
            hf, hb = carry
            # forward direction walks this block front-to-back ...
            hf = _gru_cell(gxf_ref[i].astype(jnp.float32), hf, whf, bnf, H)
            of_ref[i] = hf.astype(of_ref.dtype)
            # ... backward direction walks its (block-index-reversed) tile
            # back-to-front, so global time runs T-1 .. 0 with no jnp.flip.
            j = t_tile - 1 - i
            hb = _gru_cell(gxb_ref[j].astype(jnp.float32), hb, whb, bnb, H)
            ob_ref[j] = hb.astype(ob_ref.dtype)
            return hf, hb

        hf, hb = lax.fori_loop(0, t_tile, step, (hf_sc[...], hb_sc[...]),
                               unroll=unroll)
        hf_sc[...] = hf
        hb_sc[...] = hb

    return kernel


def _proj_from_x_kernel(x_ref, wf_ref, wb_ref, bf_ref, bb_ref, gf_ref, gb_ref):
    """gx for both directions from the embedded input: one big MXU matmul each."""
    x = x_ref[...]
    gf = jnp.dot(x, wf_ref[...], preferred_element_type=jnp.float32) + bf_ref[...]
    gb = jnp.dot(x, wb_ref[...], preferred_element_type=jnp.float32) + bb_ref[...]
    gf_ref[...] = gf.astype(gf_ref.dtype)
    gb_ref[...] = gb.astype(gb_ref.dtype)


def _proj_from_pair_kernel(a_ref, b_ref, wf_ref, wb_ref, bf_ref, bb_ref,
                           gf_ref, gb_ref):
    """gx for both directions from the previous layer's (fwd, bwd) hidden streams.
    Splitting the (2H, 3H) weights at H == projecting concat([a, b], -1) without
    materializing the concatenated activation in HBM."""
    a = a_ref[...]
    b = b_ref[...]
    H = a_ref.shape[1]
    wf = wf_ref[...]
    wb = wb_ref[...]
    gf = (jnp.dot(a, wf[:H], preferred_element_type=jnp.float32)
          + jnp.dot(b, wf[H:], preferred_element_type=jnp.float32) + bf_ref[...])
    gb = (jnp.dot(a, wb[:H], preferred_element_type=jnp.float32)
          + jnp.dot(b, wb[H:], preferred_element_type=jnp.float32) + bb_ref[...])
    gf_ref[...] = gf.astype(gf_ref.dtype)
    gb_ref[...] = gb.astype(gb_ref.dtype)


def _fc_kernel(a_ref, b_ref, w_ref, bias_ref, o_ref):
    """Output head tile: logits = h_fwd @ W[:H] + h_bwd @ W[H:] + b."""
    a = a_ref[...]
    b = b_ref[...]
    H = a_ref.shape[1]
    w = w_ref[...]
    o_ref[...] = (jnp.dot(a, w[:H], preferred_element_type=jnp.float32)
                  + jnp.dot(b, w[H:], preferred_element_type=jnp.float32)
                  + bias_ref[...])


# -----------------------------------------------------------------------------
# pallas_call wrappers
# -----------------------------------------------------------------------------
# NOTE: constant-index weight/bias specs could use pipeline_mode=pl.Buffered(1) to
# drop the second (never-refetched) weight buffer; skipped here since the weight
# footprint is small next to the VMEM budget and the tile pickers already account
# for both copies.

def run_input_proj(x2, w_f, w_b, b_f, b_b, out_dtype):
    """x2: (N, D); w_*: (D, 3H); b_*: (1, 3H) f32 -> two (N, 3H) gx arrays."""
    N, D = x2.shape
    G3 = w_f.shape[1]
    xb, wb_, ob = _itemsize(x2.dtype), _itemsize(w_f.dtype), _itemsize(out_dtype)
    fixed = 2 * 2 * D * G3 * wb_                       # both dirs, double-buffered
    per_row = 2 * D * xb + 2 * 2 * G3 * ob
    rt = _pick_row_tile(N, per_row, fixed)
    full = lambda i: (0, 0)
    return pl.pallas_call(
        _proj_from_x_kernel,
        out_shape=(jax.ShapeDtypeStruct((N, G3), out_dtype),) * 2,
        grid=(N // rt,),
        in_specs=[pl.BlockSpec((rt, D), lambda i: (i, 0)),
                  pl.BlockSpec((D, G3), full),
                  pl.BlockSpec((D, G3), full),
                  pl.BlockSpec((1, G3), full),
                  pl.BlockSpec((1, G3), full)],
        out_specs=(pl.BlockSpec((rt, G3), lambda i: (i, 0)),
                   pl.BlockSpec((rt, G3), lambda i: (i, 0))),
        compiler_params=_compiler_params("parallel"),
    )(x2, w_f, w_b, b_f, b_b)


def run_pair_proj(a2, b2, w_f, w_b, b_f, b_b, out_dtype):
    """a2/b2: (N, H) fwd/bwd streams; w_*: (2H, 3H); b_*: (1, 3H) f32."""
    N, H = a2.shape
    G3 = w_f.shape[1]
    ab, wb_, ob = _itemsize(a2.dtype), _itemsize(w_f.dtype), _itemsize(out_dtype)
    fixed = 2 * 2 * (2 * H) * G3 * wb_
    per_row = 2 * 2 * H * ab + 2 * 2 * G3 * ob
    rt = _pick_row_tile(N, per_row, fixed)
    full = lambda i: (0, 0)
    return pl.pallas_call(
        _proj_from_pair_kernel,
        out_shape=(jax.ShapeDtypeStruct((N, G3), out_dtype),) * 2,
        grid=(N // rt,),
        in_specs=[pl.BlockSpec((rt, H), lambda i: (i, 0)),
                  pl.BlockSpec((rt, H), lambda i: (i, 0)),
                  pl.BlockSpec((2 * H, G3), full),
                  pl.BlockSpec((2 * H, G3), full),
                  pl.BlockSpec((1, G3), full),
                  pl.BlockSpec((1, G3), full)],
        out_specs=(pl.BlockSpec((rt, G3), lambda i: (i, 0)),
                   pl.BlockSpec((rt, G3), lambda i: (i, 0))),
        compiler_params=_compiler_params("parallel"),
    )(a2, b2, w_f, w_b, b_f, b_b)


def run_fc(a2, b2, w_t, bias):
    """a2/b2: (N, H); w_t: (2H, V); bias: (1, V) f32 -> (N, V) f32 logits.
    The vocab axis is tiled ("parallel") so weight/output blocks stay O(TILE_V)."""
    N, H = a2.shape
    V = w_t.shape[1]
    vt = _pick_col_tile(V)
    ab, wb_ = _itemsize(a2.dtype), _itemsize(w_t.dtype)
    fixed = 2 * (2 * H) * vt * wb_                     # weight tile, double-buffered
    per_row = 2 * 2 * H * ab + 2 * vt * 4
    rt = _pick_row_tile(N, per_row, fixed)
    return pl.pallas_call(
        _fc_kernel,
        out_shape=jax.ShapeDtypeStruct((N, V), jnp.float32),
        grid=(N // rt, V // vt),
        in_specs=[pl.BlockSpec((rt, H), lambda i, j: (i, 0)),
                  pl.BlockSpec((rt, H), lambda i, j: (i, 0)),
                  pl.BlockSpec((2 * H, vt), lambda i, j: (0, j)),
                  pl.BlockSpec((1, vt), lambda i, j: (0, j))],
        out_specs=pl.BlockSpec((rt, vt), lambda i, j: (i, j)),
        compiler_params=_compiler_params("parallel", "parallel"),
    )(a2, b2, w_t, bias)


def run_bigru(gx_f, gx_b, w_hh_f, w_hh_b, b_hn_f, b_hn_b, t_tile=None):
    """gx_*: (T, B, 3H); w_hh_*: (H, 3H); b_hn_*: (1, H) f32 -> h_fwd, h_bwd (T, B, H)."""
    T, B, G3 = gx_f.shape
    H = w_hh_f.shape[0]
    out_dtype = gx_f.dtype
    # v7x megacore: split the batch across the 2 TensorCores when the per-core
    # batch block stays (8,128)-legal; on v5e/v6e this is just a sequential loop.
    nb = 2 if (B % 16 == 0) else 1
    Bb = B // nb
    gxb_, hb_, wb_ = _itemsize(gx_f.dtype), _itemsize(out_dtype), _itemsize(w_hh_f.dtype)
    fixed = 2 * 2 * H * G3 * wb_ + 2 * Bb * H * 4      # resident weights + scratch
    tt = _pick_t_tile(T, Bb, H, gxb_, hb_, fixed_bytes=fixed, requested=t_tile)
    nblk = T // tt
    unroll = _pick_unroll(tt, Bb, H)
    full = lambda b, t: (0, 0)
    # TODO(synk): small-H (<=128) block-diagonal fwd+bwd matmul fuse not applied;
    # the default model has H=256 where it would waste real MXU cycles.
    return pl.pallas_call(
        _make_bigru_kernel(tt, unroll),
        out_shape=(jax.ShapeDtypeStruct((T, B, H), out_dtype),) * 2,
        grid=(nb, nblk),
        in_specs=[pl.BlockSpec((tt, Bb, G3), lambda b, t: (t, b, 0)),
                  pl.BlockSpec((tt, Bb, G3), lambda b, t: (nblk - 1 - t, b, 0)),
                  pl.BlockSpec((H, G3), full),
                  pl.BlockSpec((H, G3), full),
                  pl.BlockSpec((1, H), full),
                  pl.BlockSpec((1, H), full)],
        out_specs=(pl.BlockSpec((tt, Bb, H), lambda b, t: (t, b, 0)),
                   pl.BlockSpec((tt, Bb, H), lambda b, t: (nblk - 1 - t, b, 0))),
        scratch_shapes=[pltpu.VMEM((Bb, H), jnp.float32),
                        pltpu.VMEM((Bb, H), jnp.float32)],
        compiler_params=_compiler_params("parallel", "arbitrary"),
    )(gx_f, gx_b, w_hh_f, w_hh_b, b_hn_f, b_hn_b)


# -----------------------------------------------------------------------------
# Full GRUAE forward (Pallas path)
# -----------------------------------------------------------------------------
def gruae_forward(tokens, params, t_tile=None):
    """tokens: (batch, seq) int32 -> (batch, vocab, seq) float32."""
    B, T = tokens.shape
    # input.permute(1, 0) then embedding lookup (gather glue stays in plain JAX).
    # TODO(synk): fuse the gather into the layer-0 projection (scalar-prefetched
    # token ids + pl.Element row gather) to skip the x HBM roundtrip on v5e.
    x = jnp.take(params["embedding"], tokens.T, axis=0)            # (T, B, D)
    D = x.shape[-1]
    N = T * B
    act_dtype = params["gru"][0]["fwd"]["w_ih_t"].dtype            # matmul/activation dtype

    h_f2 = h_b2 = None
    for li, lp in enumerate(params["gru"]):
        f, b = lp["fwd"], lp["bwd"]
        if li == 0:
            gxf2, gxb2 = run_input_proj(x.reshape(N, D),
                                        f["w_ih_t"], b["w_ih_t"],
                                        f["b_gx"], b["b_gx"], act_dtype)
        else:
            gxf2, gxb2 = run_pair_proj(h_f2, h_b2,
                                       f["w_ih_t"], b["w_ih_t"],
                                       f["b_gx"], b["b_gx"], act_dtype)
        H = f["w_hh_t"].shape[0]
        h_f, h_b = run_bigru(gxf2.reshape(T, B, 3 * H), gxb2.reshape(T, B, 3 * H),
                             f["w_hh_t"], b["w_hh_t"], f["b_hn"], b["b_hn"],
                             t_tile=t_tile)
        h_f2 = h_f.reshape(N, H)
        h_b2 = h_b.reshape(N, H)
        # TODO(synk): inter-layer dropout (p=0.1) is train-mode only; omitted (eval).

    logits = run_fc(h_f2, h_b2, params["fc_w_t"], params["fc_b"])  # (N, V) f32
    logits = logits.reshape(T, B, -1)                              # (T, B, V)
    # TODO(synk): the (T,B,V)->(B,V,T) permutation could be folded into the FC
    # kernel's out_spec (in-kernel tile transpose); kept in XLA since V is tiny here.
    return jnp.transpose(logits, (1, 2, 0))                        # == .permute(1,2,0)


# -----------------------------------------------------------------------------
# Parameter preparation (done once, outside the forward pass)
# -----------------------------------------------------------------------------
def prepare_params(raw, matmul_dtype=jnp.bfloat16):
    """Pre-transpose weights (stored in `matmul_dtype` for full-rate MXU) and fold
    b_ih + the r/z parts of b_hh into the gx bias (biases kept f32)."""
    H = raw["gru"][0]["fwd"][1].shape[1]
    prepared = {
        "embedding": raw["embedding"].astype(matmul_dtype),
        "fc_w_t": raw["fc_w"].T.astype(matmul_dtype),            # (2H, V)
        "fc_b": raw["fc_b"].reshape(1, -1).astype(jnp.float32),  # (1, V)
        "gru": [],
    }
    for layer in raw["gru"]:
        lp = {}
        for d in ("fwd", "bwd"):
            w_ih, w_hh, b_ih, b_hh = layer[d]
            b_gx = b_ih + jnp.concatenate([b_hh[:2 * H], jnp.zeros((H,), b_hh.dtype)])
            lp[d] = {
                "w_ih_t": w_ih.T.astype(matmul_dtype),                     # (D_in, 3H)
                "w_hh_t": w_hh.T.astype(matmul_dtype),                     # (H, 3H)
                "b_gx": b_gx.reshape(1, -1).astype(jnp.float32),           # (1, 3H)
                "b_hn": b_hh[2 * H:].reshape(1, -1).astype(jnp.float32),   # (1, H)
            }
        prepared["gru"].append(lp)
    return prepared


# -----------------------------------------------------------------------------
# Pure-JAX reference (PyTorch-layout params, for correctness check)
# -----------------------------------------------------------------------------
def _ref_gru_layer(x, w_ih, w_hh, b_ih, b_hh):
    T, B, _ = x.shape
    H = w_hh.shape[1]

    def step(h, x_t):
        gx = x_t @ w_ih.T + b_ih
        gh = h @ w_hh.T + b_hh
        r = jax.nn.sigmoid(gx[:, :H] + gh[:, :H])
        z = jax.nn.sigmoid(gx[:, H:2 * H] + gh[:, H:2 * H])
        n = jnp.tanh(gx[:, 2 * H:] + r * gh[:, 2 * H:])
        h_new = (1.0 - z) * n + z * h
        return h_new, h_new

    _, ys = lax.scan(step, jnp.zeros((B, H), jnp.float32), x)
    return ys


def gruae_forward_ref(tokens, raw):
    x = jnp.take(raw["embedding"], tokens.T, axis=0)
    for layer in range(len(raw["gru"])):
        h_fwd = _ref_gru_layer(x, *raw["gru"][layer]["fwd"])
        h_bwd = jnp.flip(_ref_gru_layer(jnp.flip(x, axis=0),
                                        *raw["gru"][layer]["bwd"]), axis=0)
        x = jnp.concatenate([h_fwd, h_bwd], axis=-1)
    logits = x @ raw["fc_w"].T + raw["fc_b"]
    return jnp.transpose(logits, (1, 2, 0))


# -----------------------------------------------------------------------------
# Deterministic parameter construction (PyTorch layout)
# -----------------------------------------------------------------------------
def init_params(key, model_size, vocab_size, num_layers):
    H = model_size // 2
    keys = iter(jax.random.split(key, 4 + num_layers * 2 * 4))

    def nxt(shape, scale):
        return scale * jax.random.normal(next(keys), shape, dtype=jnp.float32)

    params = {
        "embedding": nxt((vocab_size, model_size), 1.0),
        "fc_w": nxt((vocab_size, model_size), 1.0 / jnp.sqrt(model_size)),
        "fc_b": nxt((vocab_size,), 0.1),
        "gru": [],
    }
    for _ in range(num_layers):
        d_in = model_size  # layer 0: model_size; layers>0: 2*H == model_size
        layer_p = {}
        for direction in ("fwd", "bwd"):
            scale = 1.0 / jnp.sqrt(H)
            layer_p[direction] = (
                nxt((3 * H, d_in), scale),  # w_ih
                nxt((3 * H, H), scale),     # w_hh
                nxt((3 * H,), scale),       # b_ih
                nxt((3 * H,), scale),       # b_hh
            )
        params["gru"].append(layer_p)
    return params


# -----------------------------------------------------------------------------
if __name__ == "__main__":
    fwd = jax.jit(gruae_forward, static_argnames=("t_tile",))
    key = jax.random.PRNGKey(0)
    k_tok, k_par, k_tok2, k_par2 = jax.random.split(key, 4)

    # --- Config A: tiny shapes, full 4-layer model, f32 matmuls (strict check). ---
    # t_tile=4 -> 2 time blocks: exercises the carried-h VMEM scratch and the
    # reversed-block index_map of the backward direction.
    MODEL_SIZE, VOCAB, LAYERS, BATCH, SEQ = 32, 16, 4, 2, 8
    tokens = jax.random.randint(k_tok, (BATCH, SEQ), 0, VOCAB, dtype=jnp.int32)
    raw = init_params(k_par, MODEL_SIZE, VOCAB, LAYERS)
    params_f32 = prepare_params(raw, matmul_dtype=jnp.float32)
    out = jax.block_until_ready(fwd(tokens, params_f32, t_tile=4))
    assert out.shape == (BATCH, VOCAB, SEQ), out.shape
    ref = jax.block_until_ready(gruae_forward_ref(tokens, raw))
    assert jnp.allclose(out, ref, atol=1e-4, rtol=1e-4), \
        float(jnp.max(jnp.abs(out - ref)))

    # --- Config B: moderate shapes, bf16 MXU inputs, lane-dense H=128 slabs,
    #     batch-split ("parallel") recurrence and multi-block time tiling. ---
    MODEL_SIZE2, VOCAB2, LAYERS2, BATCH2, SEQ2 = 256, 32, 2, 16, 32
    tokens2 = jax.random.randint(k_tok2, (BATCH2, SEQ2), 0, VOCAB2, dtype=jnp.int32)
    raw2 = init_params(k_par2, MODEL_SIZE2, VOCAB2, LAYERS2)
    params_bf16 = prepare_params(raw2, matmul_dtype=jnp.bfloat16)
    out2 = jax.block_until_ready(fwd(tokens2, params_bf16, t_tile=8))
    assert out2.shape == (BATCH2, VOCAB2, SEQ2), out2.shape
    ref2 = jax.block_until_ready(gruae_forward_ref(tokens2, raw2))
    rel = float(jnp.linalg.norm(out2 - ref2) / (jnp.linalg.norm(ref2) + 1e-8))
    assert rel < 0.15, rel   # loose tolerance: bf16 matmul inputs, f32 accumulation

    print("KERNEL_OK")
</pallas_src>

<mosaic_0001>
module attributes {stable_mosaic.version = 11 : i64} {
  func.func @_proj_from_pair_kernel(%arg0: i32, %arg1: memref<16x16xf32, #tpu.memory_space<vmem>>, %arg2: memref<16x16xf32, #tpu.memory_space<vmem>>, %arg3: memref<32x48xf32, #tpu.memory_space<vmem>>, %arg4: memref<32x48xf32, #tpu.memory_space<vmem>>, %arg5: memref<1x48xf32, #tpu.memory_space<vmem>>, %arg6: memref<1x48xf32, #tpu.memory_space<vmem>>, %arg7: memref<16x48xf32, #tpu.memory_space<vmem>>, %arg8: memref<16x48xf32, #tpu.memory_space<vmem>>) attributes {dimension_semantics = [#tpu.dimension_semantics<parallel>], iteration_bounds = array<i64: 1>, scalar_prefetch = 0 : i64, scratch_operands = 0 : i64, tpu.core_type = #tpu.core_type<tc>, window_params = [{transform_indices = @transform_0, window_bounds = array<i64: 16, 16>}, {transform_indices = @transform_1, window_bounds = array<i64: 16, 16>}, {pipeline_mode = #tpu.pipeline_mode<synchronous>, transform_indices = @transform_2, window_bounds = array<i64: 32, 48>}, {pipeline_mode = #tpu.pipeline_mode<synchronous>, transform_indices = @transform_3, window_bounds = array<i64: 32, 48>}, {pipeline_mode = #tpu.pipeline_mode<synchronous>, transform_indices = @transform_4, window_bounds = array<i64: 1, 48>}, {pipeline_mode = #tpu.pipeline_mode<synchronous>, transform_indices = @transform_5, window_bounds = array<i64: 1, 48>}, {transform_indices = @transform_6, window_bounds = array<i64: 16, 48>}, {transform_indices = @transform_7, window_bounds = array<i64: 16, 48>}]} {
    %c0 = arith.constant 0 : index
    %c0_0 = arith.constant 0 : index
    %0 = vector.load %arg1[%c0, %c0_0] : memref<16x16xf32, #tpu.memory_space<vmem>>, vector<16x16xf32>
    %c0_1 = arith.constant 0 : index
    %c0_2 = arith.constant 0 : index
    %1 = vector.load %arg2[%c0_1, %c0_2] : memref<16x16xf32, #tpu.memory_space<vmem>>, vector<16x16xf32>
    %c0_3 = arith.constant 0 : index
    %c0_4 = arith.constant 0 : index
    %2 = vector.load %arg3[%c0_3, %c0_4] : memref<32x48xf32, #tpu.memory_space<vmem>>, vector<32x48xf32>
    %c0_5 = arith.constant 0 : index
    %c0_6 = arith.constant 0 : index
    %3 = vector.load %arg4[%c0_5, %c0_6] : memref<32x48xf32, #tpu.memory_space<vmem>>, vector<32x48xf32>
    %4 = vector.extract_strided_slice %2 {offsets = [0, 0], sizes = [16, 48], strides = [1, 1]} : vector<32x48xf32> to vector<16x48xf32>
    %cst = arith.constant dense<0.000000e+00> : vector<16x48xf32>
    %5 = tpu.matmul %0, %4, %cst {dimension_numbers = #tpu.dot_dimension_numbers<[1], [0], [0], [1], [0, 0, 1, 1], [], []>} : vector<16x16xf32>, vector<16x48xf32>, vector<16x48xf32> -> vector<16x48xf32>
    %6 = vector.extract_strided_slice %2 {offsets = [16, 0], sizes = [16, 48], strides = [1, 1]} : vector<32x48xf32> to vector<16x48xf32>
    %cst_7 = arith.constant dense<0.000000e+00> : vector<16x48xf32>
    %7 = tpu.matmul %1, %6, %cst_7 {dimension_numbers = #tpu.dot_dimension_numbers<[1], [0], [0], [1], [0, 0, 1, 1], [], []>} : vector<16x16xf32>, vector<16x48xf32>, vector<16x48xf32> -> vector<16x48xf32>
    %8 = arith.addf %5, %7 : vector<16x48xf32>
    %c0_8 = arith.constant 0 : index
    %c0_9 = arith.constant 0 : index
    %9 = vector.load %arg5[%c0_8, %c0_9] : memref<1x48xf32, #tpu.memory_space<vmem>>, vector<1x48xf32>
    %10 = vector.broadcast %9 : vector<1x48xf32> to vector<16x48xf32>
    %11 = arith.addf %8, %10 : vector<16x48xf32>
    %12 = vector.extract_strided_slice %3 {offsets = [0, 0], sizes = [16, 48], strides = [1, 1]} : vector<32x48xf32> to vector<16x48xf32>
    %cst_10 = arith.constant dense<0.000000e+00> : vector<16x48xf32>
    %13 = tpu.matmul %0, %12, %cst_10 {dimension_numbers = #tpu.dot_dimension_numbers<[1], [0], [0], [1], [0, 0, 1, 1], [], []>} : vector<16x16xf32>, vector<16x48xf32>, vector<16x48xf32> -> vector<16x48xf32>
    %14 = vector.extract_strided_slice %3 {offsets = [16, 0], sizes = [16, 48], strides = [1, 1]} : vector<32x48xf32> to vector<16x48xf32>
    %cst_11 = arith.constant dense<0.000000e+00> : vector<16x48xf32>
    %15 = tpu.matmul %1, %14, %cst_11 {dimension_numbers = #tpu.dot_dimension_numbers<[1], [0], [0], [1], [0, 0, 1, 1], [], []>} : vector<16x16xf32>, vector<16x48xf32>, vector<16x48xf32> -> vector<16x48xf32>
    %16 = arith.addf %13, %15 : vector<16x48xf32>
    %c0_12 = arith.constant 0 : index
    %c0_13 = arith.constant 0 : index
    %17 = vector.load %arg6[%c0_12, %c0_13] : memref<1x48xf32, #tpu.memory_space<vmem>>, vector<1x48xf32>
    %18 = vector.broadcast %17 : vector<1x48xf32> to vector<16x48xf32>
    %19 = arith.addf %16, %18 : vector<16x48xf32>
    %c0_14 = arith.constant 0 : index
    %c0_15 = arith.constant 0 : index
    %20 = vector.load %arg7[%c0_14, %c0_15] : memref<16x48xf32, #tpu.memory_space<vmem>>, vector<16x48xf32>
    tpu.vector_store %arg7[%c0_14, %c0_15], %11 {strides = array<i32>} : memref<16x48xf32, #tpu.memory_space<vmem>>, vector<16x48xf32>,
    %c0_16 = arith.constant 0 : index
    %c0_17 = arith.constant 0 : index
    %21 = vector.load %arg8[%c0_16, %c0_17] : memref<16x48xf32, #tpu.memory_space<vmem>>, vector<16x48xf32>
    tpu.vector_store %arg8[%c0_16, %c0_17], %19 {strides = array<i32>} : memref<16x48xf32, #tpu.memory_space<vmem>>, vector<16x48xf32>,
    return
  }
  func.func @transform_0(%arg0: i32) -> (i32, i32) {
    %c0_i32 = arith.constant 0 : i32
    %c0_i32_0 = arith.constant 0 : i32
    return %arg0, %c0_i32 : i32, i32
  }
  func.func @transform_1(%arg0: i32) -> (i32, i32) {
    %c0_i32 = arith.constant 0 : i32
    %c0_i32_0 = arith.constant 0 : i32
    return %arg0, %c0_i32 : i32, i32
  }
  func.func @transform_2(%arg0: i32) -> (i32, i32) {
    %c0_i32 = arith.constant 0 : i32
    %c0_i32_0 = arith.constant 0 : i32
    %c0_i32_1 = arith.constant 0 : i32
    return %c0_i32, %c0_i32_0 : i32, i32
  }
  func.func @transform_3(%arg0: i32) -> (i32, i32) {
    %c0_i32 = arith.constant 0 : i32
    %c0_i32_0 = arith.constant 0 : i32
    %c0_i32_1 = arith.constant 0 : i32
    return %c0_i32, %c0_i32_0 : i32, i32
  }
  func.func @transform_4(%arg0: i32) -> (i32, i32) {
    %c0_i32 = arith.constant 0 : i32
    %c0_i32_0 = arith.constant 0 : i32
    %c0_i32_1 = arith.constant 0 : i32
    return %c0_i32, %c0_i32_0 : i32, i32
  }
  func.func @transform_5(%arg0: i32) -> (i32, i32) {
    %c0_i32 = arith.constant 0 : i32
    %c0_i32_0 = arith.constant 0 : i32
    %c0_i32_1 = arith.constant 0 : i32
    return %c0_i32, %c0_i32_0 : i32, i32
  }
  func.func @transform_6(%arg0: i32) -> (i32, i32) {
    %c0_i32 = arith.constant 0 : i32
    %c0_i32_0 = arith.constant 0 : i32
    return %arg0, %c0_i32 : i32, i32
  }
  func.func @transform_7(%arg0: i32) -> (i32, i32) {
    %c0_i32 = arith.constant 0 : i32
    %c0_i32_0 = arith.constant 0 : i32
    return %arg0, %c0_i32 : i32, i32
  }
}

module attributes {stable_mosaic.version = 11 : i64} {
  func.func @_proj_from_x_kernel(%arg0: i32, %arg1: memref<16x32xf32, #tpu.memory_space<vmem>>, %arg2: memref<32x48xf32, #tpu.memory_space<vmem>>, %arg3: memref<32x48xf32, #tpu.memory_space<vmem>>, %arg4: memref<1x48xf32, #tpu.memory_space<vmem>>, %arg5: memref<1x48xf32, #tpu.memory_space<vmem>>, %arg6: memref<16x48xf32, #tpu.memory_space<vmem>>, %arg7: memref<16x48xf32, #tpu.memory_space<vmem>>) attributes {dimension_semantics = [#tpu.dimension_semantics<parallel>], iteration_bounds = array<i64: 1>, scalar_prefetch = 0 : i64, scratch_operands = 0 : i64, tpu.core_type = #tpu.core_type<tc>, window_params = [{transform_indices = @transform_0, window_bounds = array<i64: 16, 32>}, {pipeline_mode = #tpu.pipeline_mode<synchronous>, transform_indices = @transform_1, window_bounds = array<i64: 32, 48>}, {pipeline_mode = #tpu.pipeline_mode<synchronous>, transform_indices = @transform_2, window_bounds = array<i64: 32, 48>}, {pipeline_mode = #tpu.pipeline_mode<synchronous>, transform_indices = @transform_3, window_bounds = array<i64: 1, 48>}, {pipeline_mode = #tpu.pipeline_mode<synchronous>, transform_indices = @transform_4, window_bounds = array<i64: 1, 48>}, {transform_indices = @transform_5, window_bounds = array<i64: 16, 48>}, {transform_indices = @transform_6, window_bounds = array<i64: 16, 48>}]} {
    %c0 = arith.constant 0 : index
    %c0_0 = arith.constant 0 : index
    %0 = vector.load %arg1[%c0, %c0_0] : memref<16x32xf32, #tpu.memory_space<vmem>>, vector<16x32xf32>
    %c0_1 = arith.constant 0 : index
    %c0_2 = arith.constant 0 : index
    %1 = vector.load %arg2[%c0_1, %c0_2] : memref<32x48xf32, #tpu.memory_space<vmem>>, vector<32x48xf32>
    %cst = arith.constant dense<0.000000e+00> : vector<16x48xf32>
    %2 = tpu.matmul %0, %1, %cst {dimension_numbers = #tpu.dot_dimension_numbers<[1], [0], [0], [1], [0, 0, 1, 1], [], []>} : vector<16x32xf32>, vector<32x48xf32>, vector<16x48xf32> -> vector<16x48xf32>
    %c0_3 = arith.constant 0 : index
    %c0_4 = arith.constant 0 : index
    %3 = vector.load %arg4[%c0_3, %c0_4] : memref<1x48xf32, #tpu.memory_space<vmem>>, vector<1x48xf32>
    %4 = vector.broadcast %3 : vector<1x48xf32> to vector<16x48xf32>
    %5 = arith.addf %2, %4 : vector<16x48xf32>
    %c0_5 = arith.constant 0 : index
    %c0_6 = arith.constant 0 : index
    %6 = vector.load %arg3[%c0_5, %c0_6] : memref<32x48xf32, #tpu.memory_space<vmem>>, vector<32x48xf32>
    %cst_7 = arith.constant dense<0.000000e+00> : vector<16x48xf32>
    %7 = tpu.matmul %0, %6, %cst_7 {dimension_numbers = #tpu.dot_dimension_numbers<[1], [0], [0], [1], [0, 0, 1, 1], [], []>} : vector<16x32xf32>, vector<32x48xf32>, vector<16x48xf32> -> vector<16x48xf32>
    %c0_8 = arith.constant 0 : index
    %c0_9 = arith.constant 0 : index
    %8 = vector.load %arg5[%c0_8, %c0_9] : memref<1x48xf32, #tpu.memory_space<vmem>>, vector<1x48xf32>
    %9 = vector.broadcast %8 : vector<1x48xf32> to vector<16x48xf32>
    %10 = arith.addf %7, %9 : vector<16x48xf32>
    %c0_10 = arith.constant 0 : index
    %c0_11 = arith.constant 0 : index
    %11 = vector.load %arg6[%c0_10, %c0_11] : memref<16x48xf32, #tpu.memory_space<vmem>>, vector<16x48xf32>
    tpu.vector_store %arg6[%c0_10, %c0_11], %5 {strides = array<i32>} : memref<16x48xf32, #tpu.memory_space<vmem>>, vector<16x48xf32>,
    %c0_12 = arith.constant 0 : index
    %c0_13 = arith.constant 0 : index
    %12 = vector.load %arg7[%c0_12, %c0_13] : memref<16x48xf32, #tpu.memory_space<vmem>>, vector<16x48xf32>
    tpu.vector_store %arg7[%c0_12, %c0_13], %10 {strides = array<i32>} : memref<16x48xf32, #tpu.memory_space<vmem>>, vector<16x48xf32>,
    return
  }
  func.func @transform_0(%arg0: i32) -> (i32, i32) {
    %c0_i32 = arith.constant 0 : i32
    %c0_i32_0 = arith.constant 0 : i32
    return %arg0, %c0_i32 : i32, i32
  }
  func.func @transform_1(%arg0: i32) -> (i32, i32) {
    %c0_i32 = arith.constant 0 : i32
    %c0_i32_0 = arith.constant 0 : i32
    %c0_i32_1 = arith.constant 0 : i32
    return %c0_i32, %c0_i32_0 : i32, i32
  }
  func.func @transform_2(%arg0: i32) -> (i32, i32) {
    %c0_i32 = arith.constant 0 : i32
    %c0_i32_0 = arith.constant 0 : i32
    %c0_i32_1 = arith.constant 0 : i32
    return %c0_i32, %c0_i32_0 : i32, i32
  }
  func.func @transform_3(%arg0: i32) -> (i32, i32) {
    %c0_i32 = arith.constant 0 : i32
    %c0_i32_0 = arith.constant 0 : i32
    %c0_i32_1 = arith.constant 0 : i32
    return %c0_i32, %c0_i32_0 : i32, i32
  }
  func.func @transform_4(%arg0: i32) -> (i32, i32) {
    %c0_i32 = arith.constant 0 : i32
    %c0_i32_0 = arith.constant 0 : i32
    %c0_i32_1 = arith.constant 0 : i32
    return %c0_i32, %c0_i32_0 : i32, i32
  }
  func.func @transform_5(%arg0: i32) -> (i32, i32) {
    %c0_i32 = arith.constant 0 : i32
    %c0_i32_0 = arith.constant 0 : i32
    return %arg0, %c0_i32 : i32, i32
  }
  func.func @transform_6(%arg0: i32) -> (i32, i32) {
    %c0_i32 = arith.constant 0 : i32
    %c0_i32_0 = arith.constant 0 : i32
    return %arg0, %c0_i32 : i32, i32
  }
}

module attributes {stable_mosaic.version = 11 : i64} {
  func.func @_fc_kernel(%arg0: i32, %arg1: i32, %arg2: memref<16x16xf32, #tpu.memory_space<vmem>>, %arg3: memref<16x16xf32, #tpu.memory_space<vmem>>, %arg4: memref<32x16xf32, #tpu.memory_space<vmem>>, %arg5: memref<1x16xf32, #tpu.memory_space<vmem>>, %arg6: memref<16x16xf32, #tpu.memory_space<vmem>>) attributes {dimension_semantics = [#tpu.dimension_semantics<parallel>, #tpu.dimension_semantics<parallel>], iteration_bounds = array<i64: 1, 1>, scalar_prefetch = 0 : i64, scratch_operands = 0 : i64, tpu.core_type = #tpu.core_type<tc>, window_params = [{transform_indices = @transform_0, window_bounds = array<i64: 16, 16>}, {transform_indices = @transform_1, window_bounds = array<i64: 16, 16>}, {transform_indices = @transform_2, window_bounds = array<i64: 32, 16>}, {transform_indices = @transform_3, window_bounds = array<i64: 1, 16>}, {transform_indices = @transform_4, window_bounds = array<i64: 16, 16>}]} {
    %c0 = arith.constant 0 : index
    %c0_0 = arith.constant 0 : index
    %0 = vector.load %arg2[%c0, %c0_0] : memref<16x16xf32, #tpu.memory_space<vmem>>, vector<16x16xf32>
    %c0_1 = arith.constant 0 : index
    %c0_2 = arith.constant 0 : index
    %1 = vector.load %arg3[%c0_1, %c0_2] : memref<16x16xf32, #tpu.memory_space<vmem>>, vector<16x16xf32>
    %c0_3 = arith.constant 0 : index
    %c0_4 = arith.constant 0 : index
    %2 = vector.load %arg4[%c0_3, %c0_4] : memref<32x16xf32, #tpu.memory_space<vmem>>, vector<32x16xf32>
    %3 = vector.extract_strided_slice %2 {offsets = [0, 0], sizes = [16, 16], strides = [1, 1]} : vector<32x16xf32> to vector<16x16xf32>
    %cst = arith.constant dense<0.000000e+00> : vector<16x16xf32>
    %4 = tpu.matmul %0, %3, %cst {dimension_numbers = #tpu.dot_dimension_numbers<[1], [0], [0], [1], [0, 0, 1, 1], [], []>} : vector<16x16xf32>, vector<16x16xf32>, vector<16x16xf32> -> vector<16x16xf32>
    %5 = vector.extract_strided_slice %2 {offsets = [16, 0], sizes = [16, 16], strides = [1, 1]} : vector<32x16xf32> to vector<16x16xf32>
    %cst_5 = arith.constant dense<0.000000e+00> : vector<16x16xf32>
    %6 = tpu.matmul %1, %5, %cst_5 {dimension_numbers = #tpu.dot_dimension_numbers<[1], [0], [0], [1], [0, 0, 1, 1], [], []>} : vector<16x16xf32>, vector<16x16xf32>, vector<16x16xf32> -> vector<16x16xf32>
    %7 = arith.addf %4, %6 : vector<16x16xf32>
    %c0_6 = arith.constant 0 : index
    %c0_7 = arith.constant 0 : index
    %8 = vector.load %arg5[%c0_6, %c0_7] : memref<1x16xf32, #tpu.memory_space<vmem>>, vector<1x16xf32>
    %9 = vector.broadcast %8 : vector<1x16xf32> to vector<16x16xf32>
    %10 = arith.addf %7, %9 : vector<16x16xf32>
    %c0_8 = arith.constant 0 : index
    %c0_9 = arith.constant 0 : index
    %11 = vector.load %arg6[%c0_8, %c0_9] : memref<16x16xf32, #tpu.memory_space<vmem>>, vector<16x16xf32>
    tpu.vector_store %arg6[%c0_8, %c0_9], %10 {strides = array<i32>} : memref<16x16xf32, #tpu.memory_space<vmem>>, vector<16x16xf32>,
    return
  }
  func.func @transform_0(%arg0: i32, %arg1: i32) -> (i32, i32) {
    %c0_i32 = arith.constant 0 : i32
    %c0_i32_0 = arith.constant 0 : i32
    return %arg0, %c0_i32 : i32, i32
  }
  func.func @transform_1(%arg0: i32, %arg1: i32) -> (i32, i32) {
    %c0_i32 = arith.constant 0 : i32
    %c0_i32_0 = arith.constant 0 : i32
    return %arg0, %c0_i32 : i32, i32
  }
  func.func @transform_2(%arg0: i32, %arg1: i32) -> (i32, i32) {
    %c0_i32 = arith.constant 0 : i32
    %c0_i32_0 = arith.constant 0 : i32
    return %c0_i32, %arg1 : i32, i32
  }
  func.func @transform_3(%arg0: i32, %arg1: i32) -> (i32, i32) {
    %c0_i32 = arith.constant 0 : i32
    %c0_i32_0 = arith.constant 0 : i32
    return %c0_i32, %arg1 : i32, i32
  }
  func.func @transform_4(%arg0: i32, %arg1: i32) -> (i32, i32) {
    %c0_i32 = arith.constant 0 : i32
    return %arg0, %arg1 : i32, i32
  }
}

module attributes {stable_mosaic.version = 11 : i64} {
  func.func @kernel(%arg0: i32, %arg1: i32, %arg2: memref<4x2x48xf32, #tpu.memory_space<vmem>>, %arg3: memref<4x2x48xf32, #tpu.memory_space<vmem>>, %arg4: memref<16x48xf32, #tpu.memory_space<vmem>>, %arg5: memref<16x48xf32, #tpu.memory_space<vmem>>, %arg6: memref<1x16xf32, #tpu.memory_space<vmem>>, %arg7: memref<1x16xf32, #tpu.memory_space<vmem>>, %arg8: memref<4x2x16xf32, #tpu.memory_space<vmem>>, %arg9: memref<4x2x16xf32, #tpu.memory_space<vmem>>, %arg10: memref<2x16xf32, #tpu.memory_space<vmem>>, %arg11: memref<2x16xf32, #tpu.memory_space<vmem>>) attributes {dimension_semantics = [#tpu.dimension_semantics<parallel>, #tpu.dimension_semantics<arbitrary>], iteration_bounds = array<i64: 1, 2>, scalar_prefetch = 0 : i64, scratch_operands = 2 : i64, tpu.core_type = #tpu.core_type<tc>, window_params = [{transform_indices = @transform_0, window_bounds = array<i64: 4, 2, 48>}, {transform_indices = @transform_1, window_bounds = array<i64: 4, 2, 48>}, {pipeline_mode = #tpu.pipeline_mode<synchronous>, transform_indices = @transform_2, window_bounds = array<i64: 16, 48>}, {pipeline_mode = #tpu.pipeline_mode<synchronous>, transform_indices = @transform_3, window_bounds = array<i64: 16, 48>}, {pipeline_mode = #tpu.pipeline_mode<synchronous>, transform_indices = @transform_4, window_bounds = array<i64: 1, 16>}, {pipeline_mode = #tpu.pipeline_mode<synchronous>, transform_indices = @transform_5, window_bounds = array<i64: 1, 16>}, {transform_indices = @transform_6, window_bounds = array<i64: 4, 2, 16>}, {transform_indices = @transform_7, window_bounds = array<i64: 4, 2, 16>}]} {
    %c0_i32 = arith.constant 0 : i32
    %0 = arith.cmpi eq, %arg1, %c0_i32 : i32
    %1 = arith.extui %0 : i1 to i32
    %c0_i32_0 = arith.constant 0 : i32
    %2 = arith.cmpi ne, %1, %c0_i32_0 : i32
    scf.if %2 {
      %cst_84 = arith.constant 0.000000e+00 : f32
      %299 = vector.broadcast %cst_84 : f32 to vector<2x16xf32>
      %c0_85 = arith.constant 0 : index
      %c0_86 = arith.constant 0 : index
      %300 = vector.load %arg10[%c0_85, %c0_86] : memref<2x16xf32, #tpu.memory_space<vmem>>, vector<2x16xf32>
      tpu.vector_store %arg10[%c0_85, %c0_86], %299 {strides = array<i32>} : memref<2x16xf32, #tpu.memory_space<vmem>>, vector<2x16xf32>,
      %cst_87 = arith.constant 0.000000e+00 : f32
      %301 = vector.broadcast %cst_87 : f32 to vector<2x16xf32>
      %c0_88 = arith.constant 0 : index
      %c0_89 = arith.constant 0 : index
      %302 = vector.load %arg11[%c0_88, %c0_89] : memref<2x16xf32, #tpu.memory_space<vmem>>, vector<2x16xf32>
      tpu.vector_store %arg11[%c0_88, %c0_89], %301 {strides = array<i32>} : memref<2x16xf32, #tpu.memory_space<vmem>>, vector<2x16xf32>,
    } else {
    }
    %c0 = arith.constant 0 : index
    %c0_1 = arith.constant 0 : index
    %3 = vector.load %arg4[%c0, %c0_1] : memref<16x48xf32, #tpu.memory_space<vmem>>, vector<16x48xf32>
    %c0_2 = arith.constant 0 : index
    %c0_3 = arith.constant 0 : index
    %4 = vector.load %arg5[%c0_2, %c0_3] : memref<16x48xf32, #tpu.memory_space<vmem>>, vector<16x48xf32>
    %c0_4 = arith.constant 0 : index
    %c0_5 = arith.constant 0 : index
    %5 = vector.load %arg6[%c0_4, %c0_5] : memref<1x16xf32, #tpu.memory_space<vmem>>, vector<1x16xf32>
    %6 = vector.shape_cast %5 : vector<1x16xf32> to vector<1x16xf32>
    %7 = vector.broadcast %6 : vector<1x16xf32> to vector<2x16xf32>
    %c0_6 = arith.constant 0 : index
    %c0_7 = arith.constant 0 : index
    %8 = vector.load %arg7[%c0_6, %c0_7] : memref<1x16xf32, #tpu.memory_space<vmem>>, vector<1x16xf32>
    %9 = vector.shape_cast %8 : vector<1x16xf32> to vector<1x16xf32>
    %10 = vector.broadcast %9 : vector<1x16xf32> to vector<2x16xf32>
    %c0_8 = arith.constant 0 : index
    %c0_9 = arith.constant 0 : index
    %11 = vector.load %arg10[%c0_8, %c0_9] : memref<2x16xf32, #tpu.memory_space<vmem>>, vector<2x16xf32>
    %c0_10 = arith.constant 0 : index
    %c0_11 = arith.constant 0 : index
    %12 = vector.load %arg11[%c0_10, %c0_11] : memref<2x16xf32, #tpu.memory_space<vmem>>, vector<2x16xf32>
    %c0_i32_12 = arith.constant 0 : i32
    %13 = arith.index_cast %c0_i32_12 : i32 to index
    %c0_13 = arith.constant 0 : index
    %c0_14 = arith.constant 0 : index
    %14 = vector.load %arg2[%13, %c0_13, %c0_14] : memref<4x2x48xf32, #tpu.memory_space<vmem>>, vector<1x2x48xf32>
    %15 = vector.shape_cast %14 : vector<1x2x48xf32> to vector<2x48xf32>
    %cst = arith.constant dense<0.000000e+00> : vector<2x48xf32>
    %16 = tpu.matmul %11, %3, %cst {dimension_numbers = #tpu.dot_dimension_numbers<[1], [0], [0], [1], [0, 0, 1, 1], [], []>} : vector<2x16xf32>, vector<16x48xf32>, vector<2x48xf32> -> vector<2x48xf32>
    %17 = vector.extract_strided_slice %15 {offsets = [0, 0], sizes = [2, 16], strides = [1, 1]} : vector<2x48xf32> to vector<2x16xf32>
    %18 = vector.extract_strided_slice %16 {offsets = [0, 0], sizes = [2, 16], strides = [1, 1]} : vector<2x48xf32> to vector<2x16xf32>
    %19 = arith.addf %17, %18 : vector<2x16xf32>
    %20 = arith.negf %19 : vector<2x16xf32>
    %21 = math.exp %20 : vector<2x16xf32>
    %cst_15 = arith.constant 1.000000e+00 : f32
    %22 = vector.broadcast %cst_15 : f32 to vector<2x16xf32>
    %23 = arith.addf %22, %21 : vector<2x16xf32>
    %24 = arith.divf %22, %23 : vector<2x16xf32>
    %25 = vector.extract_strided_slice %15 {offsets = [0, 16], sizes = [2, 16], strides = [1, 1]} : vector<2x48xf32> to vector<2x16xf32>
    %26 = vector.extract_strided_slice %16 {offsets = [0, 16], sizes = [2, 16], strides = [1, 1]} : vector<2x48xf32> to vector<2x16xf32>
    %27 = arith.addf %25, %26 : vector<2x16xf32>
    %28 = arith.negf %27 : vector<2x16xf32>
    %29 = math.exp %28 : vector<2x16xf32>
    %cst_16 = arith.constant 1.000000e+00 : f32
    %30 = vector.broadcast %cst_16 : f32 to vector<2x16xf32>
    %31 = arith.addf %30, %29 : vector<2x16xf32>
    %32 = arith.divf %30, %31 : vector<2x16xf32>
    %33 = vector.extract_strided_slice %15 {offsets = [0, 32], sizes = [2, 16], strides = [1, 1]} : vector<2x48xf32> to vector<2x16xf32>
    %34 = vector.extract_strided_slice %16 {offsets = [0, 32], sizes = [2, 16], strides = [1, 1]} : vector<2x48xf32> to vector<2x16xf32>
    %35 = arith.addf %34, %7 : vector<2x16xf32>
    %36 = arith.mulf %24, %35 : vector<2x16xf32>
    %37 = arith.addf %33, %36 : vector<2x16xf32>
    %38 = math.tanh %37 : vector<2x16xf32>
    %cst_17 = arith.constant 1.000000e+00 : f32
    %39 = vector.broadcast %cst_17 : f32 to vector<2x16xf32>
    %40 = arith.subf %39, %32 : vector<2x16xf32>
    %41 = arith.mulf %40, %38 : vector<2x16xf32>
    %42 = arith.mulf %32, %11 : vector<2x16xf32>
    %43 = arith.addf %41, %42 : vector<2x16xf32>
    %44 = arith.index_cast %c0_i32_12 : i32 to index
    %c0_18 = arith.constant 0 : index
    %c0_19 = arith.constant 0 : index
    %45 = vector.load %arg8[%44, %c0_18, %c0_19] : memref<4x2x16xf32, #tpu.memory_space<vmem>>, vector<1x2x16xf32>
    %46 = vector.shape_cast %45 : vector<1x2x16xf32> to vector<2x16xf32>
    %47 = vector.shape_cast %43 : vector<2x16xf32> to vector<1x2x16xf32>
    tpu.vector_store %arg8[%44, %c0_18, %c0_19], %47 {strides = array<i32>} : memref<4x2x16xf32, #tpu.memory_space<vmem>>, vector<1x2x16xf32>,
    %c3_i32 = arith.constant 3 : i32
    %48 = arith.subi %c3_i32, %c0_i32_12 : i32
    %49 = arith.index_cast %48 : i32 to index
    %c0_20 = arith.constant 0 : index
    %c0_21 = arith.constant 0 : index
    %50 = vector.load %arg3[%49, %c0_20, %c0_21] : memref<4x2x48xf32, #tpu.memory_space<vmem>>, vector<1x2x48xf32>
    %51 = vector.shape_cast %50 : vector<1x2x48xf32> to vector<2x48xf32>
    %cst_22 = arith.constant dense<0.000000e+00> : vector<2x48xf32>
    %52 = tpu.matmul %12, %4, %cst_22 {dimension_numbers = #tpu.dot_dimension_numbers<[1], [0], [0], [1], [0, 0, 1, 1], [], []>} : vector<2x16xf32>, vector<16x48xf32>, vector<2x48xf32> -> vector<2x48xf32>
    %53 = vector.extract_strided_slice %51 {offsets = [0, 0], sizes = [2, 16], strides = [1, 1]} : vector<2x48xf32> to vector<2x16xf32>
    %54 = vector.extract_strided_slice %52 {offsets = [0, 0], sizes = [2, 16], strides = [1, 1]} : vector<2x48xf32> to vector<2x16xf32>
    %55 = arith.addf %53, %54 : vector<2x16xf32>
    %56 = arith.negf %55 : vector<2x16xf32>
    %57 = math.exp %56 : vector<2x16xf32>
    %cst_23 = arith.constant 1.000000e+00 : f32
    %58 = vector.broadcast %cst_23 : f32 to vector<2x16xf32>
    %59 = arith.addf %58, %57 : vector<2x16xf32>
    %60 = arith.divf %58, %59 : vector<2x16xf32>
    %61 = vector.extract_strided_slice %51 {offsets = [0, 16], sizes = [2, 16], strides = [1, 1]} : vector<2x48xf32> to vector<2x16xf32>
    %62 = vector.extract_strided_slice %52 {offsets = [0, 16], sizes = [2, 16], strides = [1, 1]} : vector<2x48xf32> to vector<2x16xf32>
    %63 = arith.addf %61, %62 : vector<2x16xf32>
    %64 = arith.negf %63 : vector<2x16xf32>
    %65 = math.exp %64 : vector<2x16xf32>
    %cst_24 = arith.constant 1.000000e+00 : f32
    %66 = vector.broadcast %cst_24 : f32 to vector<2x16xf32>
    %67 = arith.addf %66, %65 : vector<2x16xf32>
    %68 = arith.divf %66, %67 : vector<2x16xf32>
    %69 = vector.extract_strided_slice %51 {offsets = [0, 32], sizes = [2, 16], strides = [1, 1]} : vector<2x48xf32> to vector<2x16xf32>
    %70 = vector.extract_strided_slice %52 {offsets = [0, 32], sizes = [2, 16], strides = [1, 1]} : vector<2x48xf32> to vector<2x16xf32>
    %71 = arith.addf %70, %10 : vector<2x16xf32>
    %72 = arith.mulf %60, %71 : vector<2x16xf32>
    %73 = arith.addf %69, %72 : vector<2x16xf32>
    %74 = math.tanh %73 : vector<2x16xf32>
    %cst_25 = arith.constant 1.000000e+00 : f32
    %75 = vector.broadcast %cst_25 : f32 to vector<2x16xf32>
    %76 = arith.subf %75, %68 : vector<2x16xf32>
    %77 = arith.mulf %76, %74 : vector<2x16xf32>
    %78 = arith.mulf %68, %12 : vector<2x16xf32>
    %79 = arith.addf %77, %78 : vector<2x16xf32>
    %80 = arith.index_cast %48 : i32 to index
    %c0_26 = arith.constant 0 : index
    %c0_27 = arith.constant 0 : index
    %81 = vector.load %arg9[%80, %c0_26, %c0_27] : memref<4x2x16xf32, #tpu.memory_space<vmem>>, vector<1x2x16xf32>
    %82 = vector.shape_cast %81 : vector<1x2x16xf32> to vector<2x16xf32>
    %83 = vector.shape_cast %79 : vector<2x16xf32> to vector<1x2x16xf32>
    tpu.vector_store %arg9[%80, %c0_26, %c0_27], %83 {strides = array<i32>} : memref<4x2x16xf32, #tpu.memory_space<vmem>>, vector<1x2x16xf32>,
    %c1_i32 = arith.constant 1 : i32
    %84 = arith.index_cast %c1_i32 : i32 to index
    %c0_28 = arith.constant 0 : index
    %c0_29 = arith.constant 0 : index
    %85 = vector.load %arg2[%84, %c0_28, %c0_29] : memref<4x2x48xf32, #tpu.memory_space<vmem>>, vector<1x2x48xf32>
    %86 = vector.shape_cast %85 : vector<1x2x48xf32> to vector<2x48xf32>
    %cst_30 = arith.constant dense<0.000000e+00> : vector<2x48xf32>
    %87 = tpu.matmul %43, %3, %cst_30 {dimension_numbers = #tpu.dot_dimension_numbers<[1], [0], [0], [1], [0, 0, 1, 1], [], []>} : vector<2x16xf32>, vector<16x48xf32>, vector<2x48xf32> -> vector<2x48xf32>
    %88 = vector.extract_strided_slice %86 {offsets = [0, 0], sizes = [2, 16], strides = [1, 1]} : vector<2x48xf32> to vector<2x16xf32>
    %89 = vector.extract_strided_slice %87 {offsets = [0, 0], sizes = [2, 16], strides = [1, 1]} : vector<2x48xf32> to vector<2x16xf32>
    %90 = arith.addf %88, %89 : vector<2x16xf32>
    %91 = arith.negf %90 : vector<2x16xf32>
    %92 = math.exp %91 : vector<2x16xf32>
    %cst_31 = arith.constant 1.000000e+00 : f32
    %93 = vector.broadcast %cst_31 : f32 to vector<2x16xf32>
    %94 = arith.addf %93, %92 : vector<2x16xf32>
    %95 = arith.divf %93, %94 : vector<2x16xf32>
    %96 = vector.extract_strided_slice %86 {offsets = [0, 16], sizes = [2, 16], strides = [1, 1]} : vector<2x48xf32> to vector<2x16xf32>
    %97 = vector.extract_strided_slice %87 {offsets = [0, 16], sizes = [2, 16], strides = [1, 1]} : vector<2x48xf32> to vector<2x16xf32>
    %98 = arith.addf %96, %97 : vector<2x16xf32>
    %99 = arith.negf %98 : vector<2x16xf32>
    %100 = math.exp %99 : vector<2x16xf32>
    %cst_32 = arith.constant 1.000000e+00 : f32
    %101 = vector.broadcast %cst_32 : f32 to vector<2x16xf32>
    %102 = arith.addf %101, %100 : vector<2x16xf32>
    %103 = arith.divf %101, %102 : vector<2x16xf32>
    %104 = vector.extract_strided_slice %86 {offsets = [0, 32], sizes = [2, 16], strides = [1, 1]} : vector<2x48xf32> to vector<2x16xf32>
    %105 = vector.extract_strided_slice %87 {offsets = [0, 32], sizes = [2, 16], strides = [1, 1]} : vector<2x48xf32> to vector<2x16xf32>
    %106 = arith.addf %105, %7 : vector<2x16xf32>
    %107 = arith.mulf %95, %106 : vector<2x16xf32>
    %108 = arith.addf %104, %107 : vector<2x16xf32>
    %109 = math.tanh %108 : vector<2x16xf32>
    %cst_33 = arith.constant 1.000000e+00 : f32
    %110 = vector.broadcast %cst_33 : f32 to vector<2x16xf32>
    %111 = arith.subf %110, %103 : vector<2x16xf32>
    %112 = arith.mulf %111, %109 : vector<2x16xf32>
    %113 = arith.mulf %103, %43 : vector<2x16xf32>
    %114 = arith.addf %112, %113 : vector<2x16xf32>
    %115 = arith.index_cast %c1_i32 : i32 to index
    %c0_34 = arith.constant 0 : index
    %c0_35 = arith.constant 0 : index
    %116 = vector.load %arg8[%115, %c0_34, %c0_35] : memref<4x2x16xf32, #tpu.memory_space<vmem>>, vector<1x2x16xf32>
    %117 = vector.shape_cast %116 : vector<1x2x16xf32> to vector<2x16xf32>
    %118 = vector.shape_cast %114 : vector<2x16xf32> to vector<1x2x16xf32>
    tpu.vector_store %arg8[%115, %c0_34, %c0_35], %118 {strides = array<i32>} : memref<4x2x16xf32, #tpu.memory_space<vmem>>, vector<1x2x16xf32>,
    %c3_i32_36 = arith.constant 3 : i32
    %119 = arith.subi %c3_i32_36, %c1_i32 : i32
    %120 = arith.index_cast %119 : i32 to index
    %c0_37 = arith.constant 0 : index
    %c0_38 = arith.constant 0 : index
    %121 = vector.load %arg3[%120, %c0_37, %c0_38] : memref<4x2x48xf32, #tpu.memory_space<vmem>>, vector<1x2x48xf32>
    %122 = vector.shape_cast %121 : vector<1x2x48xf32> to vector<2x48xf32>
    %cst_39 = arith.constant dense<0.000000e+00> : vector<2x48xf32>
    %123 = tpu.matmul %79, %4, %cst_39 {dimension_numbers = #tpu.dot_dimension_numbers<[1], [0], [0], [1], [0, 0, 1, 1], [], []>} : vector<2x16xf32>, vector<16x48xf32>, vector<2x48xf32> -> vector<2x48xf32>
    %124 = vector.extract_strided_slice %122 {offsets = [0, 0], sizes = [2, 16], strides = [1, 1]} : vector<2x48xf32> to vector<2x16xf32>
    %125 = vector.extract_strided_slice %123 {offsets = [0, 0], sizes = [2, 16], strides = [1, 1]} : vector<2x48xf32> to vector<2x16xf32>
    %126 = arith.addf %124, %125 : vector<2x16xf32>
    %127 = arith.negf %126 : vector<2x16xf32>
    %128 = math.exp %127 : vector<2x16xf32>
    %cst_40 = arith.constant 1.000000e+00 : f32
    %129 = vector.broadcast %cst_40 : f32 to vector<2x16xf32>
    %130 = arith.addf %129, %128 : vector<2x16xf32>
    %131 = arith.divf %129, %130 : vector<2x16xf32>
    %132 = vector.extract_strided_slice %122 {offsets = [0, 16], sizes = [2, 16], strides = [1, 1]} : vector<2x48xf32> to vector<2x16xf32>
    %133 = vector.extract_strided_slice %123 {offsets = [0, 16], sizes = [2, 16], strides = [1, 1]} : vector<2x48xf32> to vector<2x16xf32>
    %134 = arith.addf %132, %133 : vector<2x16xf32>
    %135 = arith.negf %134 : vector<2x16xf32>
    %136 = math.exp %135 : vector<2x16xf32>
    %cst_41 = arith.constant 1.000000e+00 : f32
    %137 = vector.broadcast %cst_41 : f32 to vector<2x16xf32>
    %138 = arith.addf %137, %136 : vector<2x16xf32>
    %139 = arith.divf %137, %138 : vector<2x16xf32>
    %140 = vector.extract_strided_slice %122 {offsets = [0, 32], sizes = [2, 16], strides = [1, 1]} : vector<2x48xf32> to vector<2x16xf32>
    %141 = vector.extract_strided_slice %123 {offsets = [0, 32], sizes = [2, 16], strides = [1, 1]} : vector<2x48xf32> to vector<2x16xf32>
    %142 = arith.addf %141, %10 : vector<2x16xf32>
    %143 = arith.mulf %131, %142 : vector<2x16xf32>
    %144 = arith.addf %140, %143 : vector<2x16xf32>
    %145 = math.tanh %144 : vector<2x16xf32>
    %cst_42 = arith.constant 1.000000e+00 : f32
    %146 = vector.broadcast %cst_42 : f32 to vector<2x16xf32>
    %147 = arith.subf %146, %139 : vector<2x16xf32>
    %148 = arith.mulf %147, %145 : vector<2x16xf32>
    %149 = arith.mulf %139, %79 : vector<2x16xf32>
    %150 = arith.addf %148, %149 : vector<2x16xf32>
    %151 = arith.index_cast %119 : i32 to index
    %c0_43 = arith.constant 0 : index
    %c0_44 = arith.constant 0 : index
    %152 = vector.load %arg9[%151, %c0_43, %c0_44] : memref<4x2x16xf32, #tpu.memory_space<vmem>>, vector<1x2x16xf32>
    %153 = vector.shape_cast %152 : vector<1x2x16xf32> to vector<2x16xf32>
    %154 = vector.shape_cast %150 : vector<2x16xf32> to vector<1x2x16xf32>
    tpu.vector_store %arg9[%151, %c0_43, %c0_44], %154 {strides = array<i32>} : memref<4x2x16xf32, #tpu.memory_space<vmem>>, vector<1x2x16xf32>,
    %c2_i32 = arith.constant 2 : i32
    %155 = arith.index_cast %c2_i32 : i32 to index
    %c0_45 = arith.constant 0 : index
    %c0_46 = arith.constant 0 : index
    %156 = vector.load %arg2[%155, %c0_45, %c0_46] : memref<4x2x48xf32, #tpu.memory_space<vmem>>, vector<1x2x48xf32>
    %157 = vector.shape_cast %156 : vector<1x2x48xf32> to vector<2x48xf32>
    %cst_47 = arith.constant dense<0.000000e+00> : vector<2x48xf32>
    %158 = tpu.matmul %114, %3, %cst_47 {dimension_numbers = #tpu.dot_dimension_numbers<[1], [0], [0], [1], [0, 0, 1, 1], [], []>} : vector<2x16xf32>, vector<16x48xf32>, vector<2x48xf32> -> vector<2x48xf32>
    %159 = vector.extract_strided_slice %157 {offsets = [0, 0], sizes = [2, 16], strides = [1, 1]} : vector<2x48xf32> to vector<2x16xf32>
    %160 = vector.extract_strided_slice %158 {offsets = [0, 0], sizes = [2, 16], strides = [1, 1]} : vector<2x48xf32> to vector<2x16xf32>
    %161 = arith.addf %159, %160 : vector<2x16xf32>
    %162 = arith.negf %161 : vector<2x16xf32>
    %163 = math.exp %162 : vector<2x16xf32>
    %cst_48 = arith.constant 1.000000e+00 : f32
    %164 = vector.broadcast %cst_48 : f32 to vector<2x16xf32>
    %165 = arith.addf %164, %163 : vector<2x16xf32>
    %166 = arith.divf %164, %165 : vector<2x16xf32>
    %167 = vector.extract_strided_slice %157 {offsets = [0, 16], sizes = [2, 16], strides = [1, 1]} : vector<2x48xf32> to vector<2x16xf32>
    %168 = vector.extract_strided_slice %158 {offsets = [0, 16], sizes = [2, 16], strides = [1, 1]} : vector<2x48xf32> to vector<2x16xf32>
    %169 = arith.addf %167, %168 : vector<2x16xf32>
    %170 = arith.negf %169 : vector<2x16xf32>
    %171 = math.exp %170 : vector<2x16xf32>
    %cst_49 = arith.constant 1.000000e+00 : f32
    %172 = vector.broadcast %cst_49 : f32 to vector<2x16xf32>
    %173 = arith.addf %172, %171 : vector<2x16xf32>
    %174 = arith.divf %172, %173 : vector<2x16xf32>
    %175 = vector.extract_strided_slice %157 {offsets = [0, 32], sizes = [2, 16], strides = [1, 1]} : vector<2x48xf32> to vector<2x16xf32>
    %176 = vector.extract_strided_slice %158 {offsets = [0, 32], sizes = [2, 16], strides = [1, 1]} : vector<2x48xf32> to vector<2x16xf32>
    %177 = arith.addf %176, %7 : vector<2x16xf32>
    %178 = arith.mulf %166, %177 : vector<2x16xf32>
    %179 = arith.addf %175, %178 : vector<2x16xf32>
    %180 = math.tanh %179 : vector<2x16xf32>
    %cst_50 = arith.constant 1.000000e+00 : f32
    %181 = vector.broadcast %cst_50 : f32 to vector<2x16xf32>
    %182 = arith.subf %181, %174 : vector<2x16xf32>
    %183 = arith.mulf %182, %180 : vector<2x16xf32>
    %184 = arith.mulf %174, %114 : vector<2x16xf32>
    %185 = arith.addf %183, %184 : vector<2x16xf32>
    %186 = arith.index_cast %c2_i32 : i32 to index
    %c0_51 = arith.constant 0 : index
    %c0_52 = arith.constant 0 : index
    %187 = vector.load %arg8[%186, %c0_51, %c0_52] : memref<4x2x16xf32, #tpu.memory_space<vmem>>, vector<1x2x16xf32>
    %188 = vector.shape_cast %187 : vector<1x2x16xf32> to vector<2x16xf32>
    %189 = vector.shape_cast %185 : vector<2x16xf32> to vector<1x2x16xf32>
    tpu.vector_store %arg8[%186, %c0_51, %c0_52], %189 {strides = array<i32>} : memref<4x2x16xf32, #tpu.memory_space<vmem>>, vector<1x2x16xf32>,
    %c3_i32_53 = arith.constant 3 : i32
    %190 = arith.subi %c3_i32_53, %c2_i32 : i32
    %191 = arith.index_cast %190 : i32 to index
    %c0_54 = arith.constant 0 : index
    %c0_55 = arith.constant 0 : index
    %192 = vector.load %arg3[%191, %c0_54, %c0_55] : memref<4x2x48xf32, #tpu.memory_space<vmem>>, vector<1x2x48xf32>
    %193 = vector.shape_cast %192 : vector<1x2x48xf32> to vector<2x48xf32>
    %cst_56 = arith.constant dense<0.000000e+00> : vector<2x48xf32>
    %194 = tpu.matmul %150, %4, %cst_56 {dimension_numbers = #tpu.dot_dimension_numbers<[1], [0], [0], [1], [0, 0, 1, 1], [], []>} : vector<2x16xf32>, vector<16x48xf32>, vector<2x48xf32> -> vector<2x48xf32>
    %195 = vector.extract_strided_slice %193 {offsets = [0, 0], sizes = [2, 16], strides = [1, 1]} : vector<2x48xf32> to vector<2x16xf32>
    %196 = vector.extract_strided_slice %194 {offsets = [0, 0], sizes = [2, 16], strides = [1, 1]} : vector<2x48xf32> to vector<2x16xf32>
    %197 = arith.addf %195, %196 : vector<2x16xf32>
    %198 = arith.negf %197 : vector<2x16xf32>
    %199 = math.exp %198 : vector<2x16xf32>
    %cst_57 = arith.constant 1.000000e+00 : f32
    %200 = vector.broadcast %cst_57 : f32 to vector<2x16xf32>
    %201 = arith.addf %200, %199 : vector<2x16xf32>
    %202 = arith.divf %200, %201 : vector<2x16xf32>
    %203 = vector.extract_strided_slice %193 {offsets = [0, 16], sizes = [2, 16], strides = [1, 1]} : vector<2x48xf32> to vector<2x16xf32>
    %204 = vector.extract_strided_slice %194 {offsets = [0, 16], sizes = [2, 16], strides = [1, 1]} : vector<2x48xf32> to vector<2x16xf32>
    %205 = arith.addf %203, %204 : vector<2x16xf32>
    %206 = arith.negf %205 : vector<2x16xf32>
    %207 = math.exp %206 : vector<2x16xf32>
    %cst_58 = arith.constant 1.000000e+00 : f32
    %208 = vector.broadcast %cst_58 : f32 to vector<2x16xf32>
    %209 = arith.addf %208, %207 : vector<2x16xf32>
    %210 = arith.divf %208, %209 : vector<2x16xf32>
    %211 = vector.extract_strided_slice %193 {offsets = [0, 32], sizes = [2, 16], strides = [1, 1]} : vector<2x48xf32> to vector<2x16xf32>
    %212 = vector.extract_strided_slice %194 {offsets = [0, 32], sizes = [2, 16], strides = [1, 1]} : vector<2x48xf32> to vector<2x16xf32>
    %213 = arith.addf %212, %10 : vector<2x16xf32>
    %214 = arith.mulf %202, %213 : vector<2x16xf32>
    %215 = arith.addf %211, %214 : vector<2x16xf32>
    %216 = math.tanh %215 : vector<2x16xf32>
    %cst_59 = arith.constant 1.000000e+00 : f32
    %217 = vector.broadcast %cst_59 : f32 to vector<2x16xf32>
    %218 = arith.subf %217, %210 : vector<2x16xf32>
    %219 = arith.mulf %218, %216 : vector<2x16xf32>
    %220 = arith.mulf %210, %150 : vector<2x16xf32>
    %221 = arith.addf %219, %220 : vector<2x16xf32>
    %222 = arith.index_cast %190 : i32 to index
    %c0_60 = arith.constant 0 : index
    %c0_61 = arith.constant 0 : index
    %223 = vector.load %arg9[%222, %c0_60, %c0_61] : memref<4x2x16xf32, #tpu.memory_space<vmem>>, vector<1x2x16xf32>
    %224 = vector.shape_cast %223 : vector<1x2x16xf32> to vector<2x16xf32>
    %225 = vector.shape_cast %221 : vector<2x16xf32> to vector<1x2x16xf32>
    tpu.vector_store %arg9[%222, %c0_60, %c0_61], %225 {strides = array<i32>} : memref<4x2x16xf32, #tpu.memory_space<vmem>>, vector<1x2x16xf32>,
    %c3_i32_62 = arith.constant 3 : i32
    %226 = arith.index_cast %c3_i32_62 : i32 to index
    %c0_63 = arith.constant 0 : index
    %c0_64 = arith.constant 0 : index
    %227 = vector.load %arg2[%226, %c0_63, %c0_64] : memref<4x2x48xf32, #tpu.memory_space<vmem>>, vector<1x2x48xf32>
    %228 = vector.shape_cast %227 : vector<1x2x48xf32> to vector<2x48xf32>
    %cst_65 = arith.constant dense<0.000000e+00> : vector<2x48xf32>
    %229 = tpu.matmul %185, %3, %cst_65 {dimension_numbers = #tpu.dot_dimension_numbers<[1], [0], [0], [1], [0, 0, 1, 1], [], []>} : vector<2x16xf32>, vector<16x48xf32>, vector<2x48xf32> -> vector<2x48xf32>
    %230 = vector.extract_strided_slice %228 {offsets = [0, 0], sizes = [2, 16], strides = [1, 1]} : vector<2x48xf32> to vector<2x16xf32>
    %231 = vector.extract_strided_slice %229 {offsets = [0, 0], sizes = [2, 16], strides = [1, 1]} : vector<2x48xf32> to vector<2x16xf32>
    %232 = arith.addf %230, %231 : vector<2x16xf32>
    %233 = arith.negf %232 : vector<2x16xf32>
    %234 = math.exp %233 : vector<2x16xf32>
    %cst_66 = arith.constant 1.000000e+00 : f32
    %235 = vector.broadcast %cst_66 : f32 to vector<2x16xf32>
    %236 = arith.addf %235, %234 : vector<2x16xf32>
    %237 = arith.divf %235, %236 : vector<2x16xf32>
    %238 = vector.extract_strided_slice %228 {offsets = [0, 16], sizes = [2, 16], strides = [1, 1]} : vector<2x48xf32> to vector<2x16xf32>
    %239 = vector.extract_strided_slice %229 {offsets = [0, 16], sizes = [2, 16], strides = [1, 1]} : vector<2x48xf32> to vector<2x16xf32>
    %240 = arith.addf %238, %239 : vector<2x16xf32>
    %241 = arith.negf %240 : vector<2x16xf32>
    %242 = math.exp %241 : vector<2x16xf32>
    %cst_67 = arith.constant 1.000000e+00 : f32
    %243 = vector.broadcast %cst_67 : f32 to vector<2x16xf32>
    %244 = arith.addf %243, %242 : vector<2x16xf32>
    %245 = arith.divf %243, %244 : vector<2x16xf32>
    %246 = vector.extract_strided_slice %228 {offsets = [0, 32], sizes = [2, 16], strides = [1, 1]} : vector<2x48xf32> to vector<2x16xf32>
    %247 = vector.extract_strided_slice %229 {offsets = [0, 32], sizes = [2, 16], strides = [1, 1]} : vector<2x48xf32> to vector<2x16xf32>
    %248 = arith.addf %247, %7 : vector<2x16xf32>
    %249 = arith.mulf %237, %248 : vector<2x16xf32>
    %250 = arith.addf %246, %249 : vector<2x16xf32>
    %251 = math.tanh %250 : vector<2x16xf32>
    %cst_68 = arith.constant 1.000000e+00 : f32
    %252 = vector.broadcast %cst_68 : f32 to vector<2x16xf32>
    %253 = arith.subf %252, %245 : vector<2x16xf32>
    %254 = arith.mulf %253, %251 : vector<2x16xf32>
    %255 = arith.mulf %245, %185 : vector<2x16xf32>
    %256 = arith.addf %254, %255 : vector<2x16xf32>
    %257 = arith.index_cast %c3_i32_62 : i32 to index
    %c0_69 = arith.constant 0 : index
    %c0_70 = arith.constant 0 : index
    %258 = vector.load %arg8[%257, %c0_69, %c0_70] : memref<4x2x16xf32, #tpu.memory_space<vmem>>, vector<1x2x16xf32>
    %259 = vector.shape_cast %258 : vector<1x2x16xf32> to vector<2x16xf32>
    %260 = vector.shape_cast %256 : vector<2x16xf32> to vector<1x2x16xf32>
    tpu.vector_store %arg8[%257, %c0_69, %c0_70], %260 {strides = array<i32>} : memref<4x2x16xf32, #tpu.memory_space<vmem>>, vector<1x2x16xf32>,
    %c3_i32_71 = arith.constant 3 : i32
    %261 = arith.subi %c3_i32_71, %c3_i32_62 : i32
    %262 = arith.index_cast %261 : i32 to index
    %c0_72 = arith.constant 0 : index
    %c0_73 = arith.constant 0 : index
    %263 = vector.load %arg3[%262, %c0_72, %c0_73] : memref<4x2x48xf32, #tpu.memory_space<vmem>>, vector<1x2x48xf32>
    %264 = vector.shape_cast %263 : vector<1x2x48xf32> to vector<2x48xf32>
    %cst_74 = arith.constant dense<0.000000e+00> : vector<2x48xf32>
    %265 = tpu.matmul %221, %4, %cst_74 {dimension_numbers = #tpu.dot_dimension_numbers<[1], [0], [0], [1], [0, 0, 1, 1], [], []>} : vector<2x16xf32>, vector<16x48xf32>, vector<2x48xf32> -> vector<2x48xf32>
    %266 = vector.extract_strided_slice %264 {offsets = [0, 0], sizes = [2, 16], strides = [1, 1]} : vector<2x48xf32> to vector<2x16xf32>
    %267 = vector.extract_strided_slice %265 {offsets = [0, 0], sizes = [2, 16], strides = [1, 1]} : vector<2x48xf32> to vector<2x16xf32>
    %268 = arith.addf %266, %267 : vector<2x16xf32>
    %269 = arith.negf %268 : vector<2x16xf32>
    %270 = math.exp %269 : vector<2x16xf32>
    %cst_75 = arith.constant 1.000000e+00 : f32
    %271 = vector.broadcast %cst_75 : f32 to vector<2x16xf32>
    %272 = arith.addf %271, %270 : vector<2x16xf32>
    %273 = arith.divf %271, %272 : vector<2x16xf32>
    %274 = vector.extract_strided_slice %264 {offsets = [0, 16], sizes = [2, 16], strides = [1, 1]} : vector<2x48xf32> to vector<2x16xf32>
    %275 = vector.extract_strided_slice %265 {offsets = [0, 16], sizes = [2, 16], strides = [1, 1]} : vector<2x48xf32> to vector<2x16xf32>
    %276 = arith.addf %274, %275 : vector<2x16xf32>
    %277 = arith.negf %276 : vector<2x16xf32>
    %278 = math.exp %277 : vector<2x16xf32>
    %cst_76 = arith.constant 1.000000e+00 : f32
    %279 = vector.broadcast %cst_76 : f32 to vector<2x16xf32>
    %280 = arith.addf %279, %278 : vector<2x16xf32>
    %281 = arith.divf %279, %280 : vector<2x16xf32>
    %282 = vector.extract_strided_slice %264 {offsets = [0, 32], sizes = [2, 16], strides = [1, 1]} : vector<2x48xf32> to vector<2x16xf32>
    %283 = vector.extract_strided_slice %265 {offsets = [0, 32], sizes = [2, 16], strides = [1, 1]} : vector<2x48xf32> to vector<2x16xf32>
    %284 = arith.addf %283, %10 : vector<2x16xf32>
    %285 = arith.mulf %273, %284 : vector<2x16xf32>
    %286 = arith.addf %282, %285 : vector<2x16xf32>
    %287 = math.tanh %286 : vector<2x16xf32>
    %cst_77 = arith.constant 1.000000e+00 : f32
    %288 = vector.broadcast %cst_77 : f32 to vector<2x16xf32>
    %289 = arith.subf %288, %281 : vector<2x16xf32>
    %290 = arith.mulf %289, %287 : vector<2x16xf32>
    %291 = arith.mulf %281, %221 : vector<2x16xf32>
    %292 = arith.addf %290, %291 : vector<2x16xf32>
    %293 = arith.index_cast %261 : i32 to index
    %c0_78 = arith.constant 0 : index
    %c0_79 = arith.constant 0 : index
    %294 = vector.load %arg9[%293, %c0_78, %c0_79] : memref<4x2x16xf32, #tpu.memory_space<vmem>>, vector<1x2x16xf32>
    %295 = vector.shape_cast %294 : vector<1x2x16xf32> to vector<2x16xf32>
    %296 = vector.shape_cast %292 : vector<2x16xf32> to vector<1x2x16xf32>
    tpu.vector_store %arg9[%293, %c0_78, %c0_79], %296 {strides = array<i32>} : memref<4x2x16xf32, #tpu.memory_space<vmem>>, vector<1x2x16xf32>,
    %c4_i32 = arith.constant 4 : i32
    %c0_80 = arith.constant 0 : index
    %c0_81 = arith.constant 0 : index
    %297 = vector.load %arg10[%c0_80, %c0_81] : memref<2x16xf32, #tpu.memory_space<vmem>>, vector<2x16xf32>
    tpu.vector_store %arg10[%c0_80, %c0_81], %256 {strides = array<i32>} : memref<2x16xf32, #tpu.memory_space<vmem>>, vector<2x16xf32>,
    %c0_82 = arith.constant 0 : index
    %c0_83 = arith.constant 0 : index
    %298 = vector.load %arg11[%c0_82, %c0_83] : memref<2x16xf32, #tpu.memory_space<vmem>>, vector<2x16xf32>
    tpu.vector_store %arg11[%c0_82, %c0_83], %292 {strides = array<i32>} : memref<2x16xf32, #tpu.memory_space<vmem>>, vector<2x16xf32>,
    return
  }
  func.func @transform_0(%arg0: i32, %arg1: i32) -> (i32, i32, i32) {
    %c0_i32 = arith.constant 0 : i32
    %c0_i32_0 = arith.constant 0 : i32
    return %arg1, %arg0, %c0_i32 : i32, i32, i32
  }
  func.func @transform_1(%arg0: i32, %arg1: i32) -> (i32, i32, i32) {
    %c1_i32 = arith.constant 1 : i32
    %0 = arith.subi %c1_i32, %arg1 : i32
    %c0_i32 = arith.constant 0 : i32
    %c0_i32_0 = arith.constant 0 : i32
    return %0, %arg0, %c0_i32 : i32, i32, i32
  }
  func.func @transform_2(%arg0: i32, %arg1: i32) -> (i32, i32) {
    %c0_i32 = arith.constant 0 : i32
    %c0_i32_0 = arith.constant 0 : i32
    %c0_i32_1 = arith.constant 0 : i32
    return %c0_i32, %c0_i32_0 : i32, i32
  }
  func.func @transform_3(%arg0: i32, %arg1: i32) -> (i32, i32) {
    %c0_i32 = arith.constant 0 : i32
    %c0_i32_0 = arith.constant 0 : i32
    %c0_i32_1 = arith.constant 0 : i32
    return %c0_i32, %c0_i32_0 : i32, i32
  }
  func.func @transform_4(%arg0: i32, %arg1: i32) -> (i32, i32) {
    %c0_i32 = arith.constant 0 : i32
    %c0_i32_0 = arith.constant 0 : i32
    %c0_i32_1 = arith.constant 0 : i32
    return %c0_i32, %c0_i32_0 : i32, i32
  }
  func.func @transform_5(%arg0: i32, %arg1: i32) -> (i32, i32) {
    %c0_i32 = arith.constant 0 : i32
    %c0_i32_0 = arith.constant 0 : i32
    %c0_i32_1 = arith.constant 0 : i32
    return %c0_i32, %c0_i32_0 : i32, i32
  }
  func.func @transform_6(%arg0: i32, %arg1: i32) -> (i32, i32, i32) {
    %c0_i32 = arith.constant 0 : i32
    %c0_i32_0 = arith.constant 0 : i32
    return %arg1, %arg0, %c0_i32 : i32, i32, i32
  }
  func.func @transform_7(%arg0: i32, %arg1: i32) -> (i32, i32, i32) {
    %c1_i32 = arith.constant 1 : i32
    %0 = arith.subi %c1_i32, %arg1 : i32
    %c0_i32 = arith.constant 0 : i32
    %c0_i32_0 = arith.constant 0 : i32
    return %0, %arg0, %c0_i32 : i32, i32, i32
  }
}

</mosaic_0001>

<bundles_post_ra>
// kernel: gruae_forward.17
= control target key start
LH: loop header
LB: loop body
LE: loop exit
PB: predicated region body
PF: predicated region fallthrough
CT: control target
= control target key end

     0   :  { %vm25_vm0 = vcmask 130048   ;;  %s304_s2 = inlined_call_operand.vmem [shape: f32[32,16], index: 2, kind: input, shape index: {}]   ;;  %s305_s1 = inlined_call_operand.vmem [shape: f32[16,16], index: 1, kind: input, shape index: {}]   ;;  %s306_s0 = inlined_call_operand.vmem [shape: f32[16,16], index: 0, kind: input, shape index: {}]   ;;  %s307_s3 = inlined_call_operand.vmem [shape: f32[1,16], index: 3, kind: input, shape index: {}]   ;;  %s308_s4 = inlined_call_operand.vmem [shape: f32[16,16], index: 4, kind: output, shape index: {}]  }
   0x1   :  { %v23_v0 = vld [vmem:[%s304_s2 + $0x10] sm:$0xff]  ;;  %v24_v1 = vld [vmem:[%s304_s2 + $0x18] sm:$0xff]  ;;  %v21_v2 = vld [vmem:[%s304_s2] sm:$0xff] }
   0x2   :  { %v230_v3 = vpack.c.bf16 %v24_v1, %v23_v0  ;;  %v22_v4 = vld [vmem:[%s304_s2 + $0x8] sm:$0xff]  ;;  %v19_v5 = vld [vmem:[%s305_s1] sm:$0xff] }
   0x3   :  { %v234_v6 = vpack.c.bf16 %v22_v4, %v21_v2  ;;  %220 = vmatprep.mubr.msk.f32.mxu1 %vm25_vm0, %v19_v5  ;;  %v17_v7 = vld [vmem:[%s306_s0] sm:$0xff]  ;;  %v20_v8 = vld [vmem:[%s305_s1 + $0x8] sm:$0xff] }
   0x4   :  { %231 = vmatprep.subr.bf16.mxu1 %v230_v3  ;;  %227 = vmatprep.mubr.msk.f32.mxu0 %vm25_vm0, %v17_v7  ;;  %v18_v9 = vld [vmem:[%s306_s0 + $0x8] sm:$0xff]  ;;  %v207_v12 = vld [vmem:[%s307_s3] ss:$0 sm:$0xff] }
   0x5   :  { %235 = vmatprep.subr.bf16.mxu0 %v234_v6  ;;  %233 = vmatpush3.bf16.msra.mxu1 %v230_v3 }
   0x6   :  { %237 = vmatpush3.bf16.msra.mxu0 %v234_v6 }
   0x8   :  { %221 = vmatmul.mubr.msk.f32.vlgmr.msra.gmra.mrb[0].mxu1 %vm25_vm0, %v20_v8 }
   0x9   :  { %228 = vmatmul.mubr.msk.f32.vlgmr.msra.gmra.mrb[0].mxu0 %vm25_vm0, %v18_v9 }
  0xdb   :  { %v222_v10 = vpop.f32.mrb[0].mxu1 }
  0xdc   :  { %v229_v11 = vpop.f32.mrb[0].mxu0  ;;  %v98_v13 = vpop.f32.mrb[1].mxu1 }
  0xdd   :  { %v185_v14 = vadd.f32 %v229_v11, %v222_v10  ;;  %v179_v15 = vpop.f32.mrb[1].mxu0 }
  0xde   :  { %v180_v16 = vadd.f32 %v179_v15, %v98_v13 }
  0xdf   :  { %v196_v17 = vadd.f32 %v207_v12, %v185_v14 }
  0xe0   :  { %v195_v18 = vadd.f32 %v207_v12, %v180_v16 }
  0xe1   :  { %198 = vst.msk [vmem:[%s308_s4 + $0x8] sm:$0xff] %vm25_vm0, %v196_v17 }
  0xe2   :  { %197 = vst.msk [vmem:[%s308_s4] sm:$0xff] %vm25_vm0, %v195_v18 }

// kernel: gruae_forward.9
= control target key start
LH: loop header
LB: loop body
LE: loop exit
PB: predicated region body
PF: predicated region fallthrough
CT: control target
= control target key end

     0   :  { %vm35_vm0 = vcmask 261120   ;;  %vm203_vm1 = vcmask 392192   ;;  %s359_s1 = inlined_call_operand.vmem [shape: f32[32,48], index: 1, kind: input, shape index: {}]   ;;  %s360_s2 = inlined_call_operand.vmem [shape: f32[32,48], index: 2, kind: input, shape index: {}]   ;;  %s361_s0 = inlined_call_operand.vmem [shape: f32[16,32], index: 0, kind: input, shape index: {}]   ;;  %s362_s3 = inlined_call_operand.vmem [shape: f32[1,48], index: 3, kind: input, shape index: {}]   ;;  %s363_s4 = inlined_call_operand.vmem [shape: f32[1,48], index: 4, kind: input, shape index: {}]   ;;  %s364_s5 = inlined_call_operand.vmem [shape: f32[16,48], index: 5, kind: output, shape index: {0}]   ;;  %s365_s6 = inlined_call_operand.vmem [shape: f32[16,48], index: 6, kind: output, shape index: {1}]  }
   0x1   :  { %v24_v0 = vld [vmem:[%s359_s1] sm:$0xff]  ;;  %v25_v1 = vld [vmem:[%s359_s1 + $0x8] sm:$0xff]  ;;  %v26_v5 = vld [vmem:[%s359_s1 + $0x10] sm:$0xff] }
   0x2   :  { %v117_v2 = vld [vmem:[%s360_s2] sm:$0xff]  ;;  %v256_v3 = vpack.c.bf16 %v25_v1, %v24_v0  ;;  %v118_v4 = vld [vmem:[%s360_s2 + $0x8] sm:$0xff]  ;;  %v27_v6 = vld [vmem:[%s359_s1 + $0x18] sm:$0xff] }
   0x3   :  { %v264_v7 = vpack.c.bf16 %v118_v4, %v117_v2  ;;  %v260_v8 = vpack.c.bf16 %v27_v6, %v26_v5  ;;  %v119_v9 = vld [vmem:[%s360_s2 + $0x10] sm:$0xff]  ;;  %v120_v10 = vld [vmem:[%s360_s2 + $0x18] sm:$0xff]  ;;  %v22_v11 = vld [vmem:[%s361_s0] sm:$0xff] }
   0x4   :  { %257 = vmatprep.subr.bf16.mxu0 %v256_v3  ;;  %v268_v12 = vpack.c.bf16 %v120_v10, %v119_v9  ;;  %242 = vmatprep.mubr.msk.f32.mxu0 %vm35_vm0, %v22_v11  ;;  %v23_v13 = vld [vmem:[%s361_s0 + $0x8] sm:$0xff]  ;;  %v216_v14 = vld [vmem:[%s362_s3] ss:$0 sm:$0xff] }
   0x5   :  { %265 = vmatprep.subr.bf16.mxu1 %v264_v7  ;;  %259 = vmatpush3.bf16.msra.mxu0 %v256_v3  ;;  %v219_v15 = vld [vmem:[%s363_s4] ss:$0 sm:$0xff] }
   0x6   :  { %267 = vmatpush3.bf16.msra.mxu1 %v264_v7  ;;  %261 = vmatprep.subr.bf16.mxu0 %v260_v8 }
   0x7   :  { %269 = vmatprep.subr.bf16.mxu1 %v268_v12  ;;  %253 = vmatprep.mubr.msk.f32.mxu1 %vm35_vm0, %v22_v11 }
   0x9   :  { %263 = vmatpush3.bf16.msra.mxu0 %v260_v8 }
   0xa   :  { %271 = vmatpush3.bf16.msra.mxu1 %v268_v12 }
   0xc   :  { %243 = vmatmul.mubr.msk.f32.vlgmr.msra.gmra.mrb[0].mxu0 %vm35_vm0, %v23_v13 }
   0xd   :  { %254 = vmatmul.mubr.msk.f32.vlgmr.msra.gmra.mrb[0].mxu1 %vm35_vm0, %v23_v13 }
  0xdf   :  { %v244_v16 = vpop.f32.mrb[0].mxu0 }
  0xe0   :  { %v114_v17 = vadd.f32 %v244_v16, %v216_v14  ;;  %v255_v18 = vpop.f32.mrb[0].mxu1  ;;  %v108_v19 = vpop.f32.mrb[1].mxu0 }
  0xe1   :  { %v200_v20 = vadd.f32 %v255_v18, %v219_v15  ;;  %v109_v21 = vadd.f32 %v216_v14, %v108_v19  ;;  %v194_v22 = vpop.f32.mrb[1].mxu1 }
  0xe2   :  { %205 = vst.msk [vmem:[%s364_s5 + $0x8] sm:$0xff] %vm203_vm1, %v114_v17  ;;  %v195_v23 = vadd.f32 %v219_v15, %v194_v22 }
  0xe3   :  { %207 = vst.msk [vmem:[%s365_s6 + $0x8] sm:$0xff] %vm203_vm1, %v200_v20  ;;  %204 = vst.msk [vmem:[%s364_s5] sm:$0xff] %vm203_vm1, %v109_v21 }
  0xe4   :  { %206 = vst.msk [vmem:[%s365_s6] sm:$0xff] %vm203_vm1, %v195_v23 }

// kernel: gruae_forward.11
= control target key start
LH: loop header
LB: loop body
LE: loop exit
PB: predicated region body
PF: predicated region fallthrough
CT: control target
= control target key end

     0   :  { %vm37_vm0 = vcmask 130048   ;;  %vm368_vm1 = vcmask 392192   ;;  %s557_s2 = inlined_call_operand.vmem [shape: f32[32,48], index: 2, kind: input, shape index: {}]   ;;  %s558_s3 = inlined_call_operand.vmem [shape: f32[32,48], index: 3, kind: input, shape index: {}]   ;;  %s559_s1 = inlined_call_operand.vmem [shape: f32[16,16], index: 1, kind: input, shape index: {}]   ;;  %s560_s0 = inlined_call_operand.vmem [shape: f32[16,16], index: 0, kind: input, shape index: {}]   ;;  %s561_s4 = inlined_call_operand.vmem [shape: f32[1,48], index: 4, kind: input, shape index: {}]   ;;  %s562_s5 = inlined_call_operand.vmem [shape: f32[1,48], index: 5, kind: input, shape index: {}]   ;;  %s563_s6 = inlined_call_operand.vmem [shape: f32[16,48], index: 6, kind: output, shape index: {0}]   ;;  %s564_s7 = inlined_call_operand.vmem [shape: f32[16,48], index: 7, kind: output, shape index: {1}]  }
   0x1   :  { %v31_v0 = vld [vmem:[%s557_s2 + $0x10] sm:$0xff]  ;;  %v32_v1 = vld [vmem:[%s557_s2 + $0x18] sm:$0xff]  ;;  %v27_v5 = vld [vmem:[%s559_s1] sm:$0xff] }
   0x2   :  { %v35_v2 = vld [vmem:[%s558_s3 + $0x10] sm:$0xff]  ;;  %v435_v3 = vpack.c.bf16 %v32_v1, %v31_v0  ;;  %v36_v4 = vld [vmem:[%s558_s3 + $0x18] sm:$0xff]  ;;  %411 = vmatprep.mubr.msk.f32.mxu0 %vm37_vm0, %v27_v5  ;;  %425 = vmatprep.mubr.msk.f32.mxu1 %vm37_vm0, %v27_v5  ;;  %v29_v7 = vld [vmem:[%s557_s2] sm:$0xff] }
   0x3   :  { %v443_v6 = vpack.c.bf16 %v36_v4, %v35_v2  ;;  %v30_v8 = vld [vmem:[%s557_s2 + $0x8] sm:$0xff]  ;;  %v33_v9 = vld [vmem:[%s558_s3] sm:$0xff] }
   0x4   :  { %436 = vmatprep.subr.bf16.mxu0 %v435_v3  ;;  %v439_v10 = vpack.c.bf16 %v30_v8, %v29_v7  ;;  %v34_v11 = vld [vmem:[%s558_s3 + $0x8] sm:$0xff]  ;;  %v25_v14 = vld [vmem:[%s560_s0] sm:$0xff] }
   0x5   :  { %444 = vmatprep.subr.bf16.mxu1 %v443_v6  ;;  %438 = vmatpush3.bf16.msra.mxu0 %v435_v3  ;;  %v28_v12 = vld [vmem:[%s559_s1 + $0x8] sm:$0xff]  ;;  %v447_v13 = vpack.c.bf16 %v34_v11, %v33_v9  ;;  %v385_v16 = vld [vmem:[%s561_s4] ss:$0 sm:$0xff] }
   0x6   :  { %446 = vmatpush3.bf16.msra.mxu1 %v443_v6  ;;  %440 = vmatprep.subr.bf16.mxu0 %v439_v10  ;;  %v26_v15 = vld [vmem:[%s560_s0 + $0x8] sm:$0xff]  ;;  %v390_v17 = vld [vmem:[%s562_s5] ss:$0 sm:$0xff] }
   0x7   :  { %448 = vmatprep.subr.bf16.mxu1 %v447_v13 }
   0x8   :  { %412 = vmatmul.mubr.msk.f32.vlgmr.msra.gmra.mrb[0].mxu0 %vm37_vm0, %v28_v12 }
   0x9   :  { %426 = vmatmul.mubr.msk.f32.vlgmr.msra.gmra.mrb[0].mxu1 %vm37_vm0, %v28_v12  ;;  %442 = vmatpush3.bf16.msra.mxu0 %v439_v10 }
   0xa   :  { %450 = vmatpush3.bf16.msra.mxu1 %v447_v13  ;;  %418 = vmatprep.mubr.msk.f32.mxu0 %vm37_vm0, %v25_v14 }
   0xb   :  { %432 = vmatprep.mubr.msk.f32.mxu1 %vm37_vm0, %v25_v14 }
  0x10   :  { %419 = vmatmul.mubr.msk.f32.vlgmr.msra.gmra.mrb[0].mxu0 %vm37_vm0, %v26_v15 }
  0x11   :  { %433 = vmatmul.mubr.msk.f32.vlgmr.msra.gmra.mrb[0].mxu1 %vm37_vm0, %v26_v15 }
  0xe3   :  { %v420_v18 = vpop.f32.mrb[0].mxu0 }
  0xe4   :  { %v208_v19 = vadd.f32 %v420_v18, %v385_v16  ;;  %v434_v20 = vpop.f32.mrb[0].mxu1  ;;  %v191_v21 = vpop.f32.mrb[1].mxu0 }
  0xe5   :  { %v367_v22 = vadd.f32 %v434_v20, %v390_v17  ;;  %v207_v23 = vadd.f32 %v385_v16, %v191_v21  ;;  %v350_v24 = vpop.f32.mrb[1].mxu1 }
  0xe6   :  { %370 = vst.msk [vmem:[%s563_s6 + $0x8] sm:$0xff] %vm368_vm1, %v208_v19  ;;  %v366_v25 = vadd.f32 %v390_v17, %v350_v24 }
  0xe7   :  { %372 = vst.msk [vmem:[%s564_s7 + $0x8] sm:$0xff] %vm368_vm1, %v367_v22  ;;  %369 = vst.msk [vmem:[%s563_s6] sm:$0xff] %vm368_vm1, %v207_v23 }
  0xe8   :  { %371 = vst.msk [vmem:[%s564_s7] sm:$0xff] %vm368_vm1, %v366_v25 }

// kernel: gruae_forward.10
= control target key start
LH: loop header
LB: loop body
LE: loop exit
PB: predicated region body
PF: predicated region fallthrough
CT: control target
= control target key end

     0   :  { %s1717_s24 = smov 0   ;;  %s1719_s25 = smov 0   ;;  %s1902_s0 = inlined_call_operand.vmem [shape: f32[8,2,48], index: 0, kind: input, shape index: {}]   ;;  %s1903_s1 = inlined_call_operand.vmem [shape: f32[8,2,48], index: 1, kind: input, shape index: {}]   ;;  %s1904_s2 = inlined_call_operand.vmem [shape: f32[16,48], index: 2, kind: input, shape index: {}]   ;;  %s1905_s3 = inlined_call_operand.vmem [shape: f32[16,48], index: 3, kind: input, shape index: {}]   ;;  %s1906_s4 = inlined_call_operand.vmem [shape: f32[1,16], index: 4, kind: input, shape index: {}]   ;;  %s1907_s5 = inlined_call_operand.vmem [shape: f32[1,16], index: 5, kind: input, shape index: {}]   ;;  %s1908_s6 = inlined_call_operand.vmem [shape: f32[8,2,16], index: 6, kind: output, shape index: {0}]   ;;  %s1909_s7 = inlined_call_operand.vmem [shape: f32[8,2,16], index: 7, kind: output, shape index: {1}]  }
   0x1   :  { %s1721_s26 = smov 0  }
   0x2 LB: > { %s27_s27 = sadd.s32 1, %s1663_s25  ;;  %p1419_p0 = scmp.ge.s32.totalorder %s1667_s26, 1  ;;  %s1667_s26 = sphi %s1721_s26, %s18_s26   ;;  %s1663_s25 = sphi %s1719_s25, %s1911_s25   ;;  %s1659_s24 = sphi %s1717_s24, %s1910_s24  }
   0x3   : > { %p28_p1 = scmp.ge.s32.totalorder %s27_s27, 2  ;;  %p284_p2 = scmp.lt.s32.totalorder %s1667_s26, 3 }
   0x5   : > { %s1913_s27 = smov (%p28_p1, %s27_s27), 0  ;;  %p285_p3 = pnand %p1419_p0, %p284_p2 }
   0x6   : > { %s1420_s28 = sshll.u32 (!%p285_p3), %s1659_s24, 2  ;;  %s349_s29 = ssub.s32 (!%p285_p3), 1, %s1659_s24 }
   0x7   : > { %288 = sbr.rel (%p285_p3) target bundleno = 2808 (0xaf8), region = 44  ;;  %p341_p4 = scmp.lt.s32.totalorder (!%p285_p3), %s1420_s28, 7 }
   0x8   : > { %s1422_s30 = sshll.u32 (!%p285_p3), %s349_s29, 2  ;;  %p1428_p6 = scmp.ne.s32.totalorder (!%p285_p3), %s1659_s24, 0 }
   0x9   : > { %p351_p5 = scmp.lt.s32.totalorder (!%p285_p3), %s1422_s30, 7 }
   0xe   : > { %s1915_s28 = smov (!%p341_p4, %s1420_s28), 7  ;;  %s1917_s30 = smov (!%p351_p5, %s1422_s30), 7 }
   0xf   : > { %s1421_s8 = sshll.u32 %s1915_s28, 1  ;;  %s1423_s12 = sshll.u32 %s1917_s30, 1  ;;  %vm384_vm0 = vcmask (!%p1428_p6), 123904   ;;  %v1669_v0 = vmov (!%p1428_p6), 0.0  }
  0x10   : > { %s1738_s11 = scalar_lea.vmem %s1902_s0, %s1421_s8  ;;  %s1743_s15 = scalar_lea.vmem %s1903_s1, %s1423_s12  ;;  %385 = vst.msk [vmem:[#allocation2] sm:$0x3] (!%p1428_p6), %vm384_vm0, %v1669_v0  ;;  %386 = vst.msk [vmem:[#allocation3] sm:$0x3] (!%p1428_p6), %vm384_vm0, %v1669_v0 }
  0x11   : > { %s1748_s18 = scalar_lea.vmem %s1908_s6, %s1421_s8  ;;  %s1753_s21 = scalar_lea.vmem %s1909_s7, %s1423_s12 }
  0x12   : > { %383 = sbr.rel (%p1428_p6) target bundleno = 25 (0x19), region = 48 }
  0x19 PF: > { %v387_v1 = vld [vmem:[%s1904_s2] sm:$0xff]  ;;  %v388_v2 = vld [vmem:[%s1904_s2 + $0x8] sm:$0xff]  ;;  %v1670_v3 = vmov 0.0|0.0   ;;  %vm1671_vm1 = vmmov 0   ;;  %v1672_v5 = vmov 0.0   ;;  %vm406_vm2 = vcmask 130048  }
  0x1a   : > { %1541 = vmatprep.subr.bf16.mxu0 %v1670_v3  ;;  %v1762_v4 = vpack.c.bf16 %v388_v2, %v387_v1  ;;  %1489 = vmatprep.mubr.msk.f32.mxu0 %vm1671_vm1, %v1672_v5  ;;  %v389_v6 = vld [vmem:[%s1905_s3] sm:$0xff]  ;;  %v390_v7 = vld [vmem:[%s1905_s3 + $0x8] sm:$0xff]  ;;  %s1673_s13 = smov 32   ;;  %s1674_s17 = smov 96   ;;  %vm517_vm3 = vcmask 123904  }
  0x1b   : > { %1544 = vmatprep.subr.bf16.mxu1 %v1670_v3  ;;  %v1773_v8 = vpack.c.bf16 %v390_v7, %v389_v6  ;;  %1496 = vmatprep.mubr.msk.f32.mxu1 %vm1671_vm1, %v1672_v5  ;;  %v1429_v9 = vld [vmem:[%s1906_s4] ss:$0 sm:$0xff]  ;;  %v404_v11 = vld [vmem:[#allocation3] sm:$0x3]  ;;  %v1433_v23 = vld [vmem:[%s1743_s15 + $0x6] sm:$0x3] }
  0x1c   : > { %1543 = vmatpush3.bf16.msra.mxu0 %v1762_v4  ;;  %v403_v10 = vld [vmem:[#allocation2] sm:$0x3]  ;;  %487 = vrot.lane.b32.xlu0 %v1429_v9, %s1673_s13  ;;  %s1675_s19 = smov 16   ;;  %s1676_s20 = smov 112   ;;  %v1437_v63 = vld [vmem:[%s1738_s11 + $0x2] sm:$0x3] }
  0x1d   : > { %1546 = vmatpush3.bf16.msra.mxu1 %v1773_v8  ;;  %v1430_v12 = vld [vmem:[%s1907_s5] ss:$0 sm:$0xff]  ;;  %1547 = vmatprep.subr.bf16.mxu0 %v1670_v3  ;;  %v1441_v1 = vld [vmem:[%s1743_s15 + $0x4] sm:$0x3] }
  0x1e   : > { %1550 = vmatprep.subr.bf16.mxu1 %v1670_v3  ;;  %v405_v21 = vld [vmem:[%s1738_s11] sm:$0x3] }
  0x1f   : > { %1490 = vmatmul.mubr.msk.f32.vlgmr.msra.gmra.mrb[0].mxu0 %vm406_vm2, %v403_v10 }
  0x20   : > { %1497 = vmatmul.mubr.msk.f32.vlgmr.msra.gmra.mrb[0].mxu1 %vm406_vm2, %v404_v11  ;;  %601 = vrot.lane.b32.xlu0 %v1430_v12, %s1673_s13 }
  0x21   : > { %1549 = vmatpush3.bf16.msra.mxu0 %v1762_v4  ;;  %1503 = vmatprep.mubr.msk.f32.mxu0 %vm1671_vm1, %v1672_v5 }
  0x22   : > { %1552 = vmatpush3.bf16.msra.mxu1 %v1773_v8  ;;  %1510 = vmatprep.mubr.msk.f32.mxu1 %vm1671_vm1, %v1672_v5 }
  0x23   : > { %1553 = vmatprep.subr.bf16.mxu0 %v1670_v3  ;;  %1556 = vmatprep.subr.bf16.mxu1 %v1670_v3 }
  0x8e   : > { %v1799_v13 = vpop.permute.xlu0 %487 }
  0x92   : > { %v1801_v15 = vpop.permute.xlu0 %601 }
  0xf2   : > { %v476_v14 = vpop.f32.mrb[0].mxu0 }
  0xf3   : > { %v1491_v16 = vpop.f32.mrb[1].mxu0  ;;  %v590_v17 = vpop.f32.mrb[0].mxu1  ;;  %v490_v18 = vadd.f32 %v1799_v13, %v476_v14  ;;  %v480_v22 = vadd.f32 %v476_v14, %v405_v21 }
  0xf4   : > { %v1498_v19 = vpop.f32.mrb[1].mxu1  ;;  %v604_v20 = vadd.f32 %v1801_v15, %v590_v17  ;;  %v594_v25 = vadd.f32 %v1433_v23, %v590_v17 }
  0xf5   : > { %492 = vrot.lane.b32.xlu1 %v490_v18, %s1674_s17  ;;  %v1432_v24 = vmul.f32 -1.442695, %v480_v22 }
  0xf6   : > { %v1435_v26 = vmul.f32 -1.442695, %v594_v25 }
  0xf7   : > { %1597 = vpow2.f32 %v1432_v24 }
  0xf8   : > { %1599 = vpow2.f32 %v1435_v26 }
  0xf9   : > { %606 = vrot.lane.b32.xlu1 %v604_v20, %s1674_s17 }
 0x101   : > { %v1598_v27 = vpop.eup %1597 }
 0x102   : > { %v484_v28 = vadd.f32 1.0, %v1598_v27  ;;  %v1600_v29 = vpop.eup %1599 }
 0x103   : > { %v598_v30 = vadd.f32 1.0, %v1600_v29 }
 0x104   : > { %1601 = vrcp.f32 %v484_v28 }
 0x105   : > { %1603 = vrcp.f32 %v598_v30 }
 0x10e   : > { %v1602_v31 = vpop.eup %1601 }
 0x10f   : > { %v1604_v34 = vpop.eup %1603  ;;  %v502_v44 = vsub.f32 1.0, %v1602_v31 }
 0x110   : > { %v616_v50 = vsub.f32 1.0, %v1604_v34 }
 0x167   : > { %v493_v32 = vpop.permute.xlu1 %492 }
 0x168   : > { %v495_v33 = vmul.f32 %v1602_v31, %v493_v32 }
 0x16a   : > { %497 = vrot.lane.b32.xlu0 %v495_v33, %s1673_s13 }
 0x16b   : > { %v607_v35 = vpop.permute.xlu1 %606 }
 0x16c   : > { %v609_v36 = vmul.f32 %v1604_v34, %v607_v35 }
 0x16e   : > { %611 = vrot.lane.b32.xlu1 %v609_v36, %s1673_s13 }
 0x172   : > { %508 = vrot.lane.b32.xlu1 %v403_v10, %s1675_s19 }
 0x176   : > { %622 = vrot.lane.b32.xlu1 %v404_v11, %s1675_s19 }
 0x1dc   : > { %v498_v37 = vpop.permute.xlu0 %497 }
 0x1dd   : > { %v500_v38 = vadd.f32 %v498_v37, %v405_v21 }
 0x1df   : > { %1605 = vtanh.f32 %v500_v38 }
 0x1e0   : > { %v612_v39 = vpop.permute.xlu1 %611 }
 0x1e1   : > { %v614_v40 = vadd.f32 %v1433_v23, %v612_v39 }
 0x1e3   : > { %1607 = vtanh.f32 %v614_v40 }
 0x1e4   : > { %v509_v43 = vpop.permute.xlu1 %508 }
 0x1e5   : > { %v511_v46 = vmul.f32 %v1602_v31, %v509_v43  ;;  %v1445_v43 = vld [vmem:[%s1738_s11 + $0x4] sm:$0x3] }
 0x1e8   : > { %v623_v48 = vpop.permute.xlu1 %622 }
 0x1e9   : > { %v1606_v41 = vpop.eup %1605  ;;  %v625_v52 = vmul.f32 %v1604_v34, %v623_v48 }
 0x1ea   : > { %504 = vrot.lane.b32.xlu0 %v1606_v41, %s1676_s20 }
 0x1ed   : > { %v1608_v42 = vpop.eup %1607 }
 0x1ee   : > { %618 = vrot.lane.b32.xlu0 %v1608_v42, %s1676_s20 }
 0x25c   : > { %v505_v45 = vpop.permute.xlu0 %504 }
 0x25d   : > { %v507_v47 = vmul.f32 %v505_v45, %v502_v44  ;;  %v1449_v45 = vld [vmem:[%s1743_s15 + $0x2] sm:$0x3] }
 0x25f   : > { %v1813_v49 = vadd.f32 %v511_v46, %v507_v47 }
 0x260   : > { %v619_v51 = vpop.permute.xlu0 %618 }
 0x261   : > { %v621_v53 = vmul.f32 %v619_v51, %v616_v50  ;;  %514 = vrot.lane.b32.xlu0 %v1813_v49, %s1676_s20 }
 0x263   : > { %v626_v54 = vadd.f32 %v625_v52, %v621_v53 }
 0x265   : > { %628 = vrot.lane.b32.xlu1 %v626_v54, %s1676_s20 }
 0x2d3   : > { %v515_v55 = vpop.permute.xlu0 %514 }
 0x2d4   : > { %518 = vst.msk [vmem:[%s1748_s18] sm:$0x3] %vm517_vm3, %v515_v55  ;;  %1504 = vmatmul.mubr.msk.f32.vlgmr.msra.gmra.mrb[2].mxu0 %vm406_vm2, %v515_v55 }
 0x2d5   : > { %1555 = vmatpush3.bf16.msra.mxu0 %v1762_v4  ;;  %1517 = vmatprep.mubr.msk.f32.mxu0 %vm1671_vm1, %v1672_v5 }
 0x2d6   : > { %1559 = vmatprep.subr.bf16.mxu0 %v1670_v3 }
 0x2d7   : > { %v629_v56 = vpop.permute.xlu1 %628 }
 0x2d8   : > { %1436 = vst.msk [vmem:[%s1753_s21 + $0x6] sm:$0x3] %vm517_vm3, %v629_v56  ;;  %1511 = vmatmul.mubr.msk.f32.vlgmr.msra.gmra.mrb[2].mxu1 %vm406_vm2, %v629_v56 }
 0x2d9   : > { %1558 = vmatpush3.bf16.msra.mxu1 %v1773_v8  ;;  %1524 = vmatprep.mubr.msk.f32.mxu1 %vm1671_vm1, %v1672_v5 }
 0x2da   : > { %1562 = vmatprep.subr.bf16.mxu1 %v1670_v3 }
 0x3a7   : > { %v703_v57 = vpop.f32.mrb[2].mxu0 }
 0x3a8   : > { %v714_v58 = vadd.f32 %v703_v57, %v1799_v13  ;;  %v1505_v59 = vpop.f32.mrb[3].mxu0  ;;  %v707_v0 = vadd.f32 %v1437_v63, %v703_v57 }
 0x3aa   : > { %716 = vrot.lane.b32.xlu0 %v714_v58, %s1674_s17  ;;  %v1439_v2 = vmul.f32 -1.442695, %v707_v0 }
 0x3ab   : > { %v810_v60 = vpop.f32.mrb[2].mxu1 }
 0x3ac   : > { %v821_v61 = vadd.f32 %v810_v60, %v1801_v15  ;;  %v1512_v62 = vpop.f32.mrb[3].mxu1  ;;  %v814_v6 = vadd.f32 %v1441_v1, %v810_v60  ;;  %1609 = vpow2.f32 %v1439_v2 }
 0x3ae   : > { %823 = vrot.lane.b32.xlu1 %v821_v61, %s1674_s17  ;;  %v1443_v7 = vmul.f32 -1.442695, %v814_v6 }
 0x3b0   : > { %1611 = vpow2.f32 %v1443_v7 }
 0x3b6   : > { %v1610_v3 = vpop.eup %1609 }
 0x3b7   : > { %v711_v9 = vadd.f32 1.0, %v1610_v3 }
 0x3b9   : > { %1613 = vrcp.f32 %v711_v9 }
 0x3ba   : > { %v1612_v10 = vpop.eup %1611 }
 0x3bb   : > { %v818_v11 = vadd.f32 1.0, %v1612_v10 }
 0x3bd   : > { %1615 = vrcp.f32 %v818_v11 }
 0x3c3   : > { %v1614_v12 = vpop.eup %1613 }
 0x3c4   : > { %v726_v26 = vsub.f32 1.0, %v1614_v12  ;;  %v732_v28 = vmul.f32 %v1614_v12, %v1813_v49 }
 0x3c7   : > { %v1616_v17 = vpop.eup %1615 }
 0x3c8   : > { %v833_v31 = vsub.f32 1.0, %v1616_v17  ;;  %v839_v33 = vmul.f32 %v1616_v17, %v626_v54 }
 0x41c   : > { %v717_v14 = vpop.permute.xlu0 %716 }
 0x41d   : > { %v719_v16 = vmul.f32 %v1614_v12, %v717_v14 }
 0x41f   : > { %721 = vrot.lane.b32.xlu0 %v719_v16, %s1673_s13 }
 0x420   : > { %v824_v18 = vpop.permute.xlu1 %823 }
 0x421   : > { %v826_v19 = vmul.f32 %v1616_v17, %v824_v18 }
 0x423   : > { %828 = vrot.lane.b32.xlu1 %v826_v19, %s1673_s13 }
 0x491   : > { %v722_v20 = vpop.permute.xlu0 %721 }
 0x492   : > { %v724_v21 = vadd.f32 %v1437_v63, %v722_v20 }
 0x494   : > { %1617 = vtanh.f32 %v724_v21 }
 0x495   : > { %v829_v22 = vpop.permute.xlu1 %828 }
 0x496   : > { %v831_v23 = vadd.f32 %v1441_v1, %v829_v22  ;;  %v1453_v22 = vld [vmem:[%s1738_s11 + $0x6] sm:$0x3] }
 0x498   : > { %1619 = vtanh.f32 %v831_v23 }
 0x49e   : > { %v1618_v24 = vpop.eup %1617 }
 0x49f   : > { %728 = vrot.lane.b32.xlu0 %v1618_v24, %s1676_s20  ;;  %v1168_v24 = vld [vmem:[%s1743_s15] sm:$0x3] }
 0x4a2   : > { %v1620_v25 = vpop.eup %1619 }
 0x4a3   : > { %835 = vrot.lane.b32.xlu1 %v1620_v25, %s1676_s20 }
 0x511   : > { %v729_v27 = vpop.permute.xlu0 %728 }
 0x512   : > { %v731_v29 = vmul.f32 %v729_v27, %v726_v26 }
 0x514   : > { %v733_v30 = vadd.f32 %v732_v28, %v731_v29 }
 0x515   : > { %v836_v32 = vpop.permute.xlu1 %835 }
 0x516   : > { %v838_v34 = vmul.f32 %v836_v32, %v833_v31  ;;  %735 = vrot.lane.b32.xlu0 %v733_v30, %s1676_s20 }
 0x518   : > { %v840_v35 = vadd.f32 %v839_v33, %v838_v34 }
 0x51a   : > { %842 = vrot.lane.b32.xlu1 %v840_v35, %s1676_s20 }
 0x588   : > { %v736_v36 = vpop.permute.xlu0 %735 }
 0x589   : > { %1440 = vst.msk [vmem:[%s1748_s18 + $0x2] sm:$0x3] %vm517_vm3, %v736_v36  ;;  %1518 = vmatmul.mubr.msk.f32.vlgmr.msra.gmra.mrb[4].mxu0 %vm406_vm2, %v736_v36 }
 0x58a   : > { %1561 = vmatpush3.bf16.msra.mxu0 %v1762_v4  ;;  %1531 = vmatprep.mubr.msk.f32.mxu0 %vm1671_vm1, %v1672_v5 }
 0x58c   : > { %v843_v37 = vpop.permute.xlu1 %842 }
 0x58d   : > { %1444 = vst.msk [vmem:[%s1753_s21 + $0x4] sm:$0x3] %vm517_vm3, %v843_v37  ;;  %1525 = vmatmul.mubr.msk.f32.vlgmr.msra.gmra.mrb[4].mxu1 %vm406_vm2, %v843_v37 }
 0x58e   : > { %1564 = vmatpush3.bf16.msra.mxu1 %v1773_v8  ;;  %1538 = vmatprep.mubr.msk.f32.mxu1 %vm1671_vm1, %v1672_v5 }
 0x65c   : > { %v917_v38 = vpop.f32.mrb[4].mxu0 }
 0x65d   : > { %v928_v39 = vadd.f32 %v917_v38, %v1799_v13  ;;  %v1519_v40 = vpop.f32.mrb[5].mxu0  ;;  %v921_v44 = vadd.f32 %v1445_v43, %v917_v38 }
 0x65f   : > { %930 = vrot.lane.b32.xlu0 %v928_v39, %s1674_s17  ;;  %v1447_v46 = vmul.f32 -1.442695, %v921_v44 }
 0x660   : > { %v1024_v4 = vpop.f32.mrb[4].mxu1 }
 0x661   : > { %v1035_v41 = vadd.f32 %v1024_v4, %v1801_v15  ;;  %v1526_v42 = vpop.f32.mrb[5].mxu1  ;;  %v1028_v8 = vadd.f32 %v1449_v45, %v1024_v4  ;;  %1621 = vpow2.f32 %v1447_v46 }
 0x663   : > { %1037 = vrot.lane.b32.xlu1 %v1035_v41, %s1674_s17  ;;  %v1451_v47 = vmul.f32 -1.442695, %v1028_v8 }
 0x665   : > { %1623 = vpow2.f32 %v1451_v47 }
 0x66b   : > { %v1622_v5 = vpop.eup %1621 }
 0x66c   : > { %v925_v48 = vadd.f32 1.0, %v1622_v5 }
 0x66e   : > { %1625 = vrcp.f32 %v925_v48 }
 0x66f   : > { %v1624_v49 = vpop.eup %1623 }
 0x670   : > { %v1032_v50 = vadd.f32 1.0, %v1624_v49 }
 0x672   : > { %1627 = vrcp.f32 %v1032_v50 }
 0x678   : > { %v1626_v51 = vpop.eup %1625 }
 0x679   : > { %v940_v63 = vsub.f32 1.0, %v1626_v51  ;;  %v946_v1 = vmul.f32 %v1626_v51, %v733_v30 }
 0x67c   : > { %v1628_v54 = vpop.eup %1627 }
 0x67d   : > { %v1047_v7 = vsub.f32 1.0, %v1628_v54  ;;  %v1053_v9 = vmul.f32 %v1628_v54, %v840_v35 }
 0x6d1   : > { %v931_v52 = vpop.permute.xlu0 %930 }
 0x6d2   : > { %v933_v53 = vmul.f32 %v1626_v51, %v931_v52 }
 0x6d4   : > { %935 = vrot.lane.b32.xlu0 %v933_v53, %s1673_s13 }
 0x6d5   : > { %v1038_v55 = vpop.permute.xlu1 %1037 }
 0x6d6   : > { %v1040_v56 = vmul.f32 %v1628_v54, %v1038_v55 }
 0x6d8   : > { %1042 = vrot.lane.b32.xlu1 %v1040_v56, %s1673_s13 }
 0x746   : > { %v936_v57 = vpop.permute.xlu0 %935 }
 0x747   : > { %v938_v58 = vadd.f32 %v1445_v43, %v936_v57 }
 0x749   : > { %1629 = vtanh.f32 %v938_v58 }
 0x74a   : > { %v1043_v59 = vpop.permute.xlu1 %1042 }
 0x74b   : > { %v1045_v60 = vadd.f32 %v1449_v45, %v1043_v59 }
 0x74d   : > { %1631 = vtanh.f32 %v1045_v60 }
 0x753   : > { %v1630_v61 = vpop.eup %1629 }
 0x754   : > { %942 = vrot.lane.b32.xlu0 %v1630_v61, %s1676_s20 }
 0x757   : > { %v1632_v62 = vpop.eup %1631 }
 0x758   : > { %1049 = vrot.lane.b32.xlu1 %v1632_v62, %s1676_s20 }
 0x7c6   : > { %v943_v0 = vpop.permute.xlu0 %942 }
 0x7c7   : > { %v945_v2 = vmul.f32 %v943_v0, %v940_v63 }
 0x7c9   : > { %v947_v6 = vadd.f32 %v946_v1, %v945_v2 }
 0x7ca   : > { %v1050_v3 = vpop.permute.xlu1 %1049 }
 0x7cb   : > { %v1052_v10 = vmul.f32 %v1050_v3, %v1047_v7  ;;  %949 = vrot.lane.b32.xlu0 %v947_v6, %s1676_s20 }
 0x7cd   : > { %v1054_v11 = vadd.f32 %v1053_v9, %v1052_v10 }
 0x7cf   : > { %1056 = vrot.lane.b32.xlu1 %v1054_v11, %s1676_s20 }
 0x83d   : > { %v950_v12 = vpop.permute.xlu0 %949 }
 0x83e   : > { %1448 = vst.msk [vmem:[%s1748_s18 + $0x4] sm:$0x3] %vm517_vm3, %v950_v12  ;;  %1532 = vmatmul.mubr.msk.f32.vlgmr.msra.gmra.mrb[6].mxu0 %vm406_vm2, %v950_v12 }
 0x841   : > { %v1057_v14 = vpop.permute.xlu1 %1056 }
 0x842   : > { %1452 = vst.msk [vmem:[%s1753_s21 + $0x2] sm:$0x3] %vm517_vm3, %v1057_v14  ;;  %1539 = vmatmul.mubr.msk.f32.vlgmr.msra.gmra.mrb[6].mxu1 %vm406_vm2, %v1057_v14 }
 0x911   : > { %v1131_v16 = vpop.f32.mrb[6].mxu0 }
 0x912   : > { %v1142_v17 = vadd.f32 %v1131_v16, %v1799_v13  ;;  %v1533_v18 = vpop.f32.mrb[7].mxu0  ;;  %v1135_v23 = vadd.f32 %v1453_v22, %v1131_v16 }
 0x914   : > { %1144 = vrot.lane.b32.xlu0 %v1142_v17, %s1674_s17  ;;  %v1455_v25 = vmul.f32 -1.442695, %v1135_v23 }
 0x915   : > { %v1237_v19 = vpop.f32.mrb[6].mxu1 }
 0x916   : > { %v1248_v20 = vadd.f32 %v1237_v19, %v1801_v15  ;;  %v1540_v21 = vpop.f32.mrb[7].mxu1  ;;  %v1241_v26 = vadd.f32 %v1237_v19, %v1168_v24  ;;  %1633 = vpow2.f32 %v1455_v25 }
 0x918   : > { %1250 = vrot.lane.b32.xlu1 %v1248_v20, %s1674_s17  ;;  %v1458_v27 = vmul.f32 -1.442695, %v1241_v26 }
 0x91a   : > { %1635 = vpow2.f32 %v1458_v27 }
 0x920   : > { %v1634_v28 = vpop.eup %1633 }
 0x921   : > { %v1139_v29 = vadd.f32 1.0, %v1634_v28 }
 0x923   : > { %1637 = vrcp.f32 %v1139_v29 }
 0x924   : > { %v1636_v13 = vpop.eup %1635 }
 0x925   : > { %v1245_v30 = vadd.f32 1.0, %v1636_v13 }
 0x927   : > { %1639 = vrcp.f32 %v1245_v30 }
 0x92d   : > { %v1638_v31 = vpop.eup %1637 }
 0x92e   : > { %v1154_v41 = vsub.f32 1.0, %v1638_v31  ;;  %v1160_v43 = vmul.f32 %v1638_v31, %v947_v6 }
 0x931   : > { %v1640_v33 = vpop.eup %1639 }
 0x932   : > { %v1260_v46 = vsub.f32 1.0, %v1640_v33  ;;  %v1266_v47 = vmul.f32 %v1640_v33, %v1054_v11 }
 0x986   : > { %v1145_v32 = vpop.permute.xlu0 %1144 }
 0x987   : > { %v1147_v15 = vmul.f32 %v1638_v31, %v1145_v32 }
 0x989   : > { %1149 = vrot.lane.b32.xlu0 %v1147_v15, %s1673_s13 }
 0x98a   : > { %v1251_v34 = vpop.permute.xlu1 %1250 }
 0x98b   : > { %v1253_v35 = vmul.f32 %v1640_v33, %v1251_v34 }
 0x98d   : > { %1255 = vrot.lane.b32.xlu1 %v1253_v35, %s1673_s13 }
 0x9fb   : > { %v1150_v36 = vpop.permute.xlu0 %1149 }
 0x9fc   : > { %v1152_v37 = vadd.f32 %v1453_v22, %v1150_v36 }
 0x9fe   : > { %1641 = vtanh.f32 %v1152_v37 }
 0x9ff   : > { %v1256_v38 = vpop.permute.xlu1 %1255 }
 0xa00   : > { %v1258_v39 = vadd.f32 %v1256_v38, %v1168_v24 }
 0xa02   : > { %1643 = vtanh.f32 %v1258_v39 }
 0xa08   : > { %v1642_v40 = vpop.eup %1641 }
 0xa09   : > { %1156 = vrot.lane.b32.xlu0 %v1642_v40, %s1676_s20 }
 0xa0c   : > { %v1644_v4 = vpop.eup %1643 }
 0xa0d   : > { %1262 = vrot.lane.b32.xlu1 %v1644_v4, %s1676_s20 }
 0xa7b   : > { %v1157_v42 = vpop.permute.xlu0 %1156 }
 0xa7c   : > { %v1159_v44 = vmul.f32 %v1157_v42, %v1154_v41 }
 0xa7e   : > { %v1161_v45 = vadd.f32 %v1160_v43, %v1159_v44 }
 0xa7f   : > { %v1263_v8 = vpop.permute.xlu1 %1262 }
 0xa80   : > { %v1265_v5 = vmul.f32 %v1263_v8, %v1260_v46  ;;  %1163 = vrot.lane.b32.xlu0 %v1161_v45, %s1676_s20 }
 0xa82   : > { %v1267_v48 = vadd.f32 %v1266_v47, %v1265_v5 }
 0xa84   : > { %1269 = vrot.lane.b32.xlu1 %v1267_v48, %s1676_s20 }
 0xaf2   : > { %v1164_v49 = vpop.permute.xlu0 %1163 }
 0xaf3   : > { %1456 = vst.msk [vmem:[%s1748_s18 + $0x6] sm:$0x3] %vm517_vm3, %v1164_v49  ;;  %1273 = vst.msk [vmem:[#allocation2] sm:$0x3] %vm517_vm3, %v1164_v49 }
 0xaf6   : > { %v1270_v50 = vpop.permute.xlu1 %1269 }
 0xaf7   : > { %1272 = vst.msk [vmem:[%s1753_s21] sm:$0x3] %vm517_vm3, %v1270_v50  ;;  %1274 = vst.msk [vmem:[#allocation3] sm:$0x3] %vm517_vm3, %v1270_v50 }
 0xaf8 PF: > { %s18_s26 = sadd.s32 1, %s1667_s26   ;;  %s1910_s24 = smov %s1663_s25 }
 0xaf9   : > { %p15_p7 = scmp.ge.s32.totalorder %s18_s26, 4   ;;  %s1911_s25 = smov %s1913_s27 }
 0xafb   :  { %17 = sbr.rel (!%p15_p7) target bundleno = 2 (0x2), region = 105 }

</bundles_post_ra>
